<compile_context>
chip_gen: v7x
topology: tpu7x:2x2x1
jax: 0.10.0
libtpu: 0.0.40
codegen_flags: <defaults>
</compile_context>

<pallas_src>
import functools

import jax
import jax.numpy as jnp
from jax import lax
from jax.experimental import pallas as pl
from jax.experimental.pallas import tpu as pltpu


def _round_up(x, m):
    return (x + m - 1) // m * m


def gru_encoder_kernel(maxlen_ref,                     # (1,)  i32 SMEM (scalar prefetch)
                       lens_ref, emb_ref,              # (Bp,1) i32, (Tc*Bp, Ep) f32
                       w_ih_ref, b_ih_ref,             # (Ep, 3Hp), (1, 3Hp)
                       w_hh_ref, b_hh_ref,             # (Hp, 3Hp), (1, 3Hp)
                       w_lin_ref, b_lin_ref,           # (Hp, Dp),  (1, Dp)
                       out_ref, hid_ref,               # (Tc, Bp, Hp), (Bp, Dp)
                       gi_s, h_s):                     # VMEM: (Tc*Bp, 3Hp), (Bp, Hp)
    Tc, Bt, H = out_ref.shape
    c = pl.program_id(0)
    t0 = c * Tc                       # global time offset of this chunk
    max_t = maxlen_ref[0]

    # Zero the hidden carry once, at the start of the time sweep.
    @pl.when(c == 0)
    def _():
        h_s[...] = jnp.zeros_like(h_s)

    # Tail-only zeroing: only chunks that touch t >= max_t memset their output
    # block; live steps below overwrite their own rows.
    @pl.when(t0 + Tc > max_t)
    def _():
        out_ref[...] = jnp.zeros_like(out_ref)

    # Chunk has at least one live step?
    @pl.when(t0 < max_t)
    def _():
        # Fused, hoisted input projection: one (Tc*Bp, E) @ (E, 3H) MXU pass
        # for the whole chunk, input bias folded in exactly once.
        gi_s[...] = (jnp.dot(emb_ref[...], w_ih_ref[...],
                             preferred_element_type=jnp.float32)
                     + b_ih_ref[...])

        # Hoisted out of the recurrence (JAX does not CSE broadcast_in_dim).
        b_hh = jnp.broadcast_to(b_hh_ref[...], (Bt, 3 * H))
        w_hh = w_hh_ref[...]
        lens = lens_ref[...]                                     # (Bt, 1) i32
        t_ids = t0 + lax.broadcasted_iota(jnp.int32, (Tc, Bt, 1), 0)
        chunk_mask = t_ids < lens[None, :, :]                    # (Tc, Bt, 1)

        def step(t):
            gi = gi_s[pl.ds(t * Bt, Bt), :]                      # (Bt, 3H) lane-aligned
            h_prev = h_s[...]                                    # (Bt, H)
            # Single fused recurrent matmul: (Bt, H) @ (H, 3H).
            gh = jnp.dot(h_prev, w_hh,
                         preferred_element_type=jnp.float32) + b_hh
            # One EUP push for r|z over a (Bt, 2H) slab.
            rz = jax.nn.sigmoid(gi[:, :2 * H] + gh[:, :2 * H])
            r = rz[:, :H]
            z = rz[:, H:]
            # PyTorch GRU: b_hh_n stays inside the r * (.) term.
            n = jnp.tanh(gi[:, 2 * H:] + r * gh[:, 2 * H:])
            h_new = (1.0 - z) * n + z * h_prev
            # pack_padded_sequence semantics: steps with t >= length[b] are
            # skipped -> hidden freezes, padded output stays zero.
            mask = chunk_mask[t]                                 # (Bt, 1) bool
            h_s[...] = jnp.where(mask, h_new, h_prev)
            out_ref[t] = jnp.where(mask, h_new, 0.0)

        # Tc is small and static (<= 16): full unroll; trailing dead steps are
        # skipped on the dynamic max length.
        for t in range(Tc):
            pl.when(t0 + t < max_t)(functools.partial(step, t))

    # hidden = tanh(Linear(h_n)); n_layers * n_directions == 1 -> just h_n.
    @pl.when(c == pl.num_programs(0) - 1)
    def _():
        hid_ref[...] = jnp.tanh(
            jnp.dot(h_s[...], w_lin_ref[...],
                    preferred_element_type=jnp.float32) + b_lin_ref[...])


def encoder_forward(source, source_length, params, *, time_chunk=8):
    """source: (S, B) int32 ids; source_length: (B,) int32 (each <= S)."""
    # Glue: embedding gather + dropout(p=0.0) == identity.
    embedded = jnp.take(params["embedding"], source, axis=0)     # (S, B, E) f32

    S, B = source.shape
    E = embedded.shape[-1]
    H = params["w_hh_r"].shape[0]
    Dd = params["w_lin"].shape[1]

    # Lane/sublane-aligned kernel shapes (f32: sublane 8, lane 128).
    Bp = _round_up(B, 8)
    Ep = _round_up(E, 128)
    Hp = _round_up(H, 128)
    Dp = _round_up(Dd, 128)
    Tc = max(1, min(int(time_chunk), 16))      # cap the per-chunk unroll
    Sp = _round_up(S, Tc)
    n_chunks = Sp // Tc

    def pad2(a, r, c):
        return jnp.pad(a, ((0, r - a.shape[0]), (0, c - a.shape[1])))

    def fuse3(wr, wz, wn, rows):
        # Gate-major fused layout: gate g occupies lanes [g*Hp, g*Hp + H).
        return jnp.concatenate(
            [pad2(wr, rows, Hp), pad2(wz, rows, Hp), pad2(wn, rows, Hp)], axis=1)

    w_ih = fuse3(params["w_ih_r"], params["w_ih_z"], params["w_ih_n"], Ep)
    b_ih = fuse3(params["b_ih_r"], params["b_ih_z"], params["b_ih_n"], 1)
    w_hh = fuse3(params["w_hh_r"], params["w_hh_z"], params["w_hh_n"], Hp)
    b_hh = fuse3(params["b_hh_r"], params["b_hh_z"], params["b_hh_n"], 1)
    w_lin = pad2(params["w_lin"], Hp, Dp)
    b_lin = pad2(params["b_lin"], 1, Dp)

    emb = jnp.pad(embedded, ((0, Sp - S), (0, Bp - B), (0, Ep - E)))
    emb2d = emb.reshape(Sp * Bp, Ep)                             # row = t*Bp + b
    lens = jnp.pad(source_length.astype(jnp.int32), (0, Bp - B)).reshape(Bp, 1)
    maxlen = jnp.max(source_length).astype(jnp.int32).reshape(1)

    grid_spec = pltpu.PrefetchScalarGridSpec(
        num_scalar_prefetch=1,
        grid=(n_chunks,),
        in_specs=[
            pl.BlockSpec((Bp, 1), lambda c, ml: (0, 0)),          # lens
            pl.BlockSpec((Tc * Bp, Ep), lambda c, ml: (c, 0)),    # emb chunk
            pl.BlockSpec((Ep, 3 * Hp), lambda c, ml: (0, 0)),     # w_ih fused
            pl.BlockSpec((1, 3 * Hp), lambda c, ml: (0, 0)),      # b_ih fused
            pl.BlockSpec((Hp, 3 * Hp), lambda c, ml: (0, 0)),     # w_hh fused
            pl.BlockSpec((1, 3 * Hp), lambda c, ml: (0, 0)),      # b_hh fused
            pl.BlockSpec((Hp, Dp), lambda c, ml: (0, 0)),         # w_lin
            pl.BlockSpec((1, Dp), lambda c, ml: (0, 0)),          # b_lin
        ],
        out_specs=(
            pl.BlockSpec((Tc, Bp, Hp), lambda c, ml: (c, 0, 0)),  # outputs chunk
            pl.BlockSpec((Bp, Dp), lambda c, ml: (0, 0)),         # hidden (resident)
        ),
        scratch_shapes=[pltpu.VMEM((Tc * Bp, 3 * Hp), jnp.float32),   # gi
                        pltpu.VMEM((Bp, Hp), jnp.float32)],           # h carry
    )

    # VMEM budget from the actual block + scratch footprint (double-buffered
    # inputs/outputs), with headroom; keeps production sizes within v7x 64 MiB.
    f32 = 4
    footprint = f32 * (
        2 * Tc * Bp * Ep                 # emb block
        + 2 * Tc * Bp * Hp               # outputs block
        + 2 * Bp * Dp                    # hidden block
        + 2 * Bp                         # lens
        + 2 * (Ep + Hp) * 3 * Hp         # fused gate weights
        + 2 * 2 * 3 * Hp                 # gate biases
        + 2 * (Hp * Dp + Dp)             # final linear
        + Tc * Bp * 3 * Hp               # gi scratch
        + Bp * Hp                        # h carry scratch
    )
    vmem_limit = int(min(128 * 1024 * 1024, max(2 * footprint, 32 * 1024 * 1024)))

    outputs_p, hidden_p = pl.pallas_call(
        gru_encoder_kernel,
        out_shape=(jax.ShapeDtypeStruct((Sp, Bp, Hp), jnp.float32),
                   jax.ShapeDtypeStruct((Bp, Dp), jnp.float32)),
        grid_spec=grid_spec,
        compiler_params=pltpu.CompilerParams(
            dimension_semantics=("arbitrary",),   # time carries state
            vmem_limit_bytes=vmem_limit),
    )(maxlen, lens, emb2d, w_ih, b_ih, w_hh, b_hh, w_lin, b_lin)

    # Strip lane/sublane/time padding.
    return outputs_p[:S, :B, :H], hidden_p[:B, :Dd]


def encoder_reference(source, source_length, params):
    """Pure-JAX reference implementing the same packed-GRU semantics."""
    embedded = jnp.take(params["embedding"], source, axis=0)
    S, B, _ = embedded.shape
    H = params["w_hh_r"].shape[0]

    def step(h, inp):
        x_t, t = inp
        r = jax.nn.sigmoid(x_t @ params["w_ih_r"] + params["b_ih_r"]
                           + h @ params["w_hh_r"] + params["b_hh_r"])
        z = jax.nn.sigmoid(x_t @ params["w_ih_z"] + params["b_ih_z"]
                           + h @ params["w_hh_z"] + params["b_hh_z"])
        n = jnp.tanh(x_t @ params["w_ih_n"] + params["b_ih_n"]
                     + r * (h @ params["w_hh_n"] + params["b_hh_n"]))
        h_new = (1.0 - z) * n + z * h
        mask = (t < source_length)[:, None]
        return jnp.where(mask, h_new, h), jnp.where(mask, h_new, 0.0)

    h0 = jnp.zeros((B, H), jnp.float32)
    h_last, ys = lax.scan(step, h0, (embedded, jnp.arange(S)))
    hidden = jnp.tanh(h_last @ params["w_lin"] + params["b_lin"])
    return ys, hidden


def init_params(key, vocab_size, emb_dim, enc_hid_dim, dec_hid_dim):
    ks = jax.random.split(key, 15)
    H = enc_hid_dim
    s_rnn = float(H) ** -0.5
    s_lin = float(H) ** -0.5
    u = lambda k, shape, s: jax.random.uniform(k, shape, jnp.float32, -s, s)
    return {
        "embedding": jax.random.normal(ks[0], (vocab_size, emb_dim), jnp.float32),
        # GRU weights stored pre-transposed (x @ W^T layout), per gate.
        "w_ih_r": u(ks[1], (emb_dim, H), s_rnn),
        "w_ih_z": u(ks[2], (emb_dim, H), s_rnn),
        "w_ih_n": u(ks[3], (emb_dim, H), s_rnn),
        "b_ih_r": u(ks[4], (1, H), s_rnn),
        "b_ih_z": u(ks[5], (1, H), s_rnn),
        "b_ih_n": u(ks[6], (1, H), s_rnn),
        "w_hh_r": u(ks[7], (H, H), s_rnn),
        "w_hh_z": u(ks[8], (H, H), s_rnn),
        "w_hh_n": u(ks[9], (H, H), s_rnn),
        "b_hh_r": u(ks[10], (1, H), s_rnn),
        "b_hh_z": u(ks[11], (1, H), s_rnn),
        "b_hh_n": u(ks[12], (1, H), s_rnn),
        "w_lin": u(ks[13], (H, dec_hid_dim), s_lin),
        "b_lin": u(ks[14], (1, dec_hid_dim), s_lin),
    }


if __name__ == "__main__":
    vocab_size, emb_dim, enc_hid_dim, dec_hid_dim = 50, 32, 32, 32
    S, B = 8, 4

    key = jax.random.PRNGKey(0)
    kp, ks = jax.random.split(key)
    params = init_params(kp, vocab_size, emb_dim, enc_hid_dim, dec_hid_dim)

    source = jax.random.randint(ks, (S, B), 0, vocab_size, dtype=jnp.int32)
    source_length = jnp.array([8, 6, 5, 3], dtype=jnp.int32)  # sorted descending

    outputs, hidden = encoder_forward(source, source_length, params)
    jax.block_until_ready((outputs, hidden))

    out_ref, hid_ref = encoder_reference(source, source_length, params)
    assert outputs.shape == (S, B, enc_hid_dim)
    assert hidden.shape == (B, dec_hid_dim)
    assert jnp.allclose(outputs, out_ref, atol=1e-5, rtol=1e-5)
    assert jnp.allclose(hidden, hid_ref, atol=1e-5, rtol=1e-5)

    print("KERNEL_OK")
</pallas_src>

<mosaic_0001>
module attributes {stable_mosaic.version = 11 : i64} {
  func.func @gru_encoder_kernel(%arg0: i32, %arg1: memref<1xi32, #tpu.memory_space<smem>>, %arg2: memref<8x1xi32, #tpu.memory_space<vmem>>, %arg3: memref<64x128xf32, #tpu.memory_space<vmem>>, %arg4: memref<128x384xf32, #tpu.memory_space<vmem>>, %arg5: memref<1x384xf32, #tpu.memory_space<vmem>>, %arg6: memref<128x384xf32, #tpu.memory_space<vmem>>, %arg7: memref<1x384xf32, #tpu.memory_space<vmem>>, %arg8: memref<128x128xf32, #tpu.memory_space<vmem>>, %arg9: memref<1x128xf32, #tpu.memory_space<vmem>>, %arg10: memref<8x8x128xf32, #tpu.memory_space<vmem>>, %arg11: memref<8x128xf32, #tpu.memory_space<vmem>>, %arg12: memref<64x384xf32, #tpu.memory_space<vmem>>, %arg13: memref<8x128xf32, #tpu.memory_space<vmem>>) attributes {dimension_semantics = [#tpu.dimension_semantics<arbitrary>], iteration_bounds = array<i64: 1>, scalar_prefetch = 1 : i64, scratch_operands = 2 : i64, tpu.core_type = #tpu.core_type<tc>, window_params = [{pipeline_mode = #tpu.pipeline_mode<synchronous>, transform_indices = @transform_0, window_bounds = array<i64: 8, 1>}, {transform_indices = @transform_1, window_bounds = array<i64: 64, 128>}, {pipeline_mode = #tpu.pipeline_mode<synchronous>, transform_indices = @transform_2, window_bounds = array<i64: 128, 384>}, {pipeline_mode = #tpu.pipeline_mode<synchronous>, transform_indices = @transform_3, window_bounds = array<i64: 1, 384>}, {pipeline_mode = #tpu.pipeline_mode<synchronous>, transform_indices = @transform_4, window_bounds = array<i64: 128, 384>}, {pipeline_mode = #tpu.pipeline_mode<synchronous>, transform_indices = @transform_5, window_bounds = array<i64: 1, 384>}, {pipeline_mode = #tpu.pipeline_mode<synchronous>, transform_indices = @transform_6, window_bounds = array<i64: 128, 128>}, {pipeline_mode = #tpu.pipeline_mode<synchronous>, transform_indices = @transform_7, window_bounds = array<i64: 1, 128>}, {transform_indices = @transform_8, window_bounds = array<i64: 8, 8, 128>}, {pipeline_mode = #tpu.pipeline_mode<synchronous>, transform_indices = @transform_9, window_bounds = array<i64: 8, 128>}]} {
    %c8_i32 = arith.constant 8 : i32
    %0 = arith.muli %arg0, %c8_i32 : i32
    %c0 = arith.constant 0 : index
    %1 = memref.load %arg1[%c0] : memref<1xi32, #tpu.memory_space<smem>>
    %c0_i32 = arith.constant 0 : i32
    %2 = arith.cmpi eq, %arg0, %c0_i32 : i32
    %3 = arith.extui %2 : i1 to i32
    %c0_i32_0 = arith.constant 0 : i32
    %4 = arith.cmpi ne, %3, %c0_i32_0 : i32
    scf.if %4 {
      %cst = arith.constant 0.000000e+00 : f32
      %15 = vector.broadcast %cst : f32 to vector<8x128xf32>
      %c0_6 = arith.constant 0 : index
      %c0_7 = arith.constant 0 : index
      %16 = vector.load %arg13[%c0_6, %c0_7] : memref<8x128xf32, #tpu.memory_space<vmem>>, vector<8x128xf32>
      tpu.vector_store %arg13[%c0_6, %c0_7], %15 {strides = array<i32>} : memref<8x128xf32, #tpu.memory_space<vmem>>, vector<8x128xf32>,
    } else {
    }
    %c8_i32_1 = arith.constant 8 : i32
    %5 = arith.addi %0, %c8_i32_1 : i32
    %6 = arith.cmpi sgt, %5, %1 : i32
    %7 = arith.extui %6 : i1 to i32
    %c0_i32_2 = arith.constant 0 : i32
    %8 = arith.cmpi ne, %7, %c0_i32_2 : i32
    scf.if %8 {
      %cst = arith.constant 0.000000e+00 : f32
      %15 = vector.broadcast %cst : f32 to vector<8x8x128xf32>
      %c0_6 = arith.constant 0 : index
      %c0_7 = arith.constant 0 : index
      %c0_8 = arith.constant 0 : index
      %16 = vector.load %arg10[%c0_6, %c0_7, %c0_8] : memref<8x8x128xf32, #tpu.memory_space<vmem>>, vector<8x8x128xf32>
      tpu.vector_store %arg10[%c0_6, %c0_7, %c0_8], %15 {strides = array<i32>} : memref<8x8x128xf32, #tpu.memory_space<vmem>>, vector<8x8x128xf32>,
    } else {
    }
    %9 = arith.cmpi slt, %0, %1 : i32
    %10 = arith.extui %9 : i1 to i32
    %c0_i32_3 = arith.constant 0 : i32
    %11 = arith.cmpi ne, %10, %c0_i32_3 : i32
    scf.if %11 {
      %c0_6 = arith.constant 0 : index
      %c0_7 = arith.constant 0 : index
      %15 = vector.load %arg3[%c0_6, %c0_7] : memref<64x128xf32, #tpu.memory_space<vmem>>, vector<64x128xf32>
      %c0_8 = arith.constant 0 : index
      %c0_9 = arith.constant 0 : index
      %16 = vector.load %arg4[%c0_8, %c0_9] : memref<128x384xf32, #tpu.memory_space<vmem>>, vector<128x384xf32>
      %cst = arith.constant dense<0.000000e+00> : vector<64x384xf32>
      %17 = tpu.matmul %15, %16, %cst {dimension_numbers = #tpu.dot_dimension_numbers<[1], [0], [0], [1], [0, 0, 1, 1], [], []>} : vector<64x128xf32>, vector<128x384xf32>, vector<64x384xf32> -> vector<64x384xf32>
      %c0_10 = arith.constant 0 : index
      %c0_11 = arith.constant 0 : index
      %18 = vector.load %arg5[%c0_10, %c0_11] : memref<1x384xf32, #tpu.memory_space<vmem>>, vector<1x384xf32>
      %19 = vector.broadcast %18 : vector<1x384xf32> to vector<64x384xf32>
      %20 = arith.addf %17, %19 : vector<64x384xf32>
      %c0_12 = arith.constant 0 : index
      %c0_13 = arith.constant 0 : index
      %21 = vector.load %arg12[%c0_12, %c0_13] : memref<64x384xf32, #tpu.memory_space<vmem>>, vector<64x384xf32>
      tpu.vector_store %arg12[%c0_12, %c0_13], %20 {strides = array<i32>} : memref<64x384xf32, #tpu.memory_space<vmem>>, vector<64x384xf32>,
      %c0_14 = arith.constant 0 : index
      %c0_15 = arith.constant 0 : index
      %22 = vector.load %arg7[%c0_14, %c0_15] : memref<1x384xf32, #tpu.memory_space<vmem>>, vector<1x384xf32>
      %23 = vector.shape_cast %22 : vector<1x384xf32> to vector<1x384xf32>
      %24 = vector.broadcast %23 : vector<1x384xf32> to vector<8x384xf32>
      %c0_16 = arith.constant 0 : index
      %c0_17 = arith.constant 0 : index
      %25 = vector.load %arg6[%c0_16, %c0_17] : memref<128x384xf32, #tpu.memory_space<vmem>>, vector<128x384xf32>
      %c0_18 = arith.constant 0 : index
      %c0_19 = arith.constant 0 : index
      %26 = vector.load %arg2[%c0_18, %c0_19] : memref<8x1xi32, #tpu.memory_space<vmem>>, vector<8x1xi32>
      %27 = tpu.iota {dimensions = array<i32: 0>} : vector<8x8x1xi32>
      %28 = vector.broadcast %0 : i32 to vector<8x8x1xi32>
      %29 = arith.addi %28, %27 : vector<8x8x1xi32>
      %30 = vector.shape_cast %26 : vector<8x1xi32> to vector<1x8x1xi32>
      %31 = vector.broadcast %30 : vector<1x8x1xi32> to vector<8x8x1xi32>
      %32 = arith.cmpi slt, %29, %31 : vector<8x8x1xi32>
      %c0_i32_20 = arith.constant 0 : i32
      %33 = arith.addi %0, %c0_i32_20 : i32
      %34 = arith.cmpi slt, %33, %1 : i32
      %35 = arith.extui %34 : i1 to i32
      %c0_i32_21 = arith.constant 0 : i32
      %36 = arith.cmpi ne, %35, %c0_i32_21 : i32
      scf.if %36 {
        %c0_29 = arith.constant 0 : index
        %c0_30 = arith.constant 0 : index
        %65 = vector.load %arg12[%c0_29, %c0_30] : memref<64x384xf32, #tpu.memory_space<vmem>>, vector<8x384xf32>
        %c0_31 = arith.constant 0 : index
        %c0_32 = arith.constant 0 : index
        %66 = vector.load %arg13[%c0_31, %c0_32] : memref<8x128xf32, #tpu.memory_space<vmem>>, vector<8x128xf32>
        %cst_33 = arith.constant dense<0.000000e+00> : vector<8x384xf32>
        %67 = tpu.matmul %66, %25, %cst_33 {dimension_numbers = #tpu.dot_dimension_numbers<[1], [0], [0], [1], [0, 0, 1, 1], [], []>} : vector<8x128xf32>, vector<128x384xf32>, vector<8x384xf32> -> vector<8x384xf32>
        %68 = arith.addf %67, %24 : vector<8x384xf32>
        %69 = vector.extract_strided_slice %65 {offsets = [0, 0], sizes = [8, 256], strides = [1, 1]} : vector<8x384xf32> to vector<8x256xf32>
        %70 = vector.extract_strided_slice %68 {offsets = [0, 0], sizes = [8, 256], strides = [1, 1]} : vector<8x384xf32> to vector<8x256xf32>
        %71 = arith.addf %69, %70 : vector<8x256xf32>
        %72 = arith.negf %71 : vector<8x256xf32>
        %73 = math.exp %72 : vector<8x256xf32>
        %cst_34 = arith.constant 1.000000e+00 : f32
        %74 = vector.broadcast %cst_34 : f32 to vector<8x256xf32>
        %75 = arith.addf %74, %73 : vector<8x256xf32>
        %76 = arith.divf %74, %75 : vector<8x256xf32>
        %77 = vector.extract_strided_slice %76 {offsets = [0, 0], sizes = [8, 128], strides = [1, 1]} : vector<8x256xf32> to vector<8x128xf32>
        %78 = vector.extract_strided_slice %76 {offsets = [0, 128], sizes = [8, 128], strides = [1, 1]} : vector<8x256xf32> to vector<8x128xf32>
        %79 = vector.extract_strided_slice %65 {offsets = [0, 256], sizes = [8, 128], strides = [1, 1]} : vector<8x384xf32> to vector<8x128xf32>
        %80 = vector.extract_strided_slice %68 {offsets = [0, 256], sizes = [8, 128], strides = [1, 1]} : vector<8x384xf32> to vector<8x128xf32>
        %81 = arith.mulf %77, %80 : vector<8x128xf32>
        %82 = arith.addf %79, %81 : vector<8x128xf32>
        %83 = math.tanh %82 : vector<8x128xf32>
        %cst_35 = arith.constant 1.000000e+00 : f32
        %84 = vector.broadcast %cst_35 : f32 to vector<8x128xf32>
        %85 = arith.subf %84, %78 : vector<8x128xf32>
        %86 = arith.mulf %85, %83 : vector<8x128xf32>
        %87 = arith.mulf %78, %66 : vector<8x128xf32>
        %88 = arith.addf %86, %87 : vector<8x128xf32>
        %89 = vector.extract_strided_slice %32 {offsets = [0, 0, 0], sizes = [1, 8, 1], strides = [1, 1, 1]} : vector<8x8x1xi1> to vector<1x8x1xi1>
        %90 = vector.shape_cast %89 : vector<1x8x1xi1> to vector<8x1xi1>
        %91 = vector.shape_cast %90 : vector<8x1xi1> to vector<8x1xi1>
        %92 = vector.broadcast %91 : vector<8x1xi1> to vector<8x128xi1>
        %93 = arith.select %92, %88, %66 : vector<8x128xi1>, vector<8x128xf32>
        %c0_36 = arith.constant 0 : index
        %c0_37 = arith.constant 0 : index
        %94 = vector.load %arg13[%c0_36, %c0_37] : memref<8x128xf32, #tpu.memory_space<vmem>>, vector<8x128xf32>
        tpu.vector_store %arg13[%c0_36, %c0_37], %93 {strides = array<i32>} : memref<8x128xf32, #tpu.memory_space<vmem>>, vector<8x128xf32>,
        %cst_38 = arith.constant 0.000000e+00 : f32
        %95 = vector.shape_cast %90 : vector<8x1xi1> to vector<8x1xi1>
        %96 = vector.broadcast %95 : vector<8x1xi1> to vector<8x128xi1>
        %97 = vector.broadcast %cst_38 : f32 to vector<8x128xf32>
        %98 = arith.select %96, %88, %97 : vector<8x128xi1>, vector<8x128xf32>
        %c0_39 = arith.constant 0 : index
        %c0_40 = arith.constant 0 : index
        %c0_41 = arith.constant 0 : index
        %99 = vector.load %arg10[%c0_39, %c0_40, %c0_41] : memref<8x8x128xf32, #tpu.memory_space<vmem>>, vector<1x8x128xf32>
        %100 = vector.shape_cast %99 : vector<1x8x128xf32> to vector<8x128xf32>
        %101 = vector.shape_cast %98 : vector<8x128xf32> to vector<1x8x128xf32>
        tpu.vector_store %arg10[%c0_39, %c0_40, %c0_41], %101 {strides = array<i32>} : memref<8x8x128xf32, #tpu.memory_space<vmem>>, vector<1x8x128xf32>,
      } else {
      }
      %c1_i32 = arith.constant 1 : i32
      %37 = arith.addi %0, %c1_i32 : i32
      %38 = arith.cmpi slt, %37, %1 : i32
      %39 = arith.extui %38 : i1 to i32
      %c0_i32_22 = arith.constant 0 : i32
      %40 = arith.cmpi ne, %39, %c0_i32_22 : i32
      scf.if %40 {
        %c8 = arith.constant 8 : index
        %c0_29 = arith.constant 0 : index
        %65 = vector.load %arg12[%c8, %c0_29] : memref<64x384xf32, #tpu.memory_space<vmem>>, vector<8x384xf32>
        %c0_30 = arith.constant 0 : index
        %c0_31 = arith.constant 0 : index
        %66 = vector.load %arg13[%c0_30, %c0_31] : memref<8x128xf32, #tpu.memory_space<vmem>>, vector<8x128xf32>
        %cst_32 = arith.constant dense<0.000000e+00> : vector<8x384xf32>
        %67 = tpu.matmul %66, %25, %cst_32 {dimension_numbers = #tpu.dot_dimension_numbers<[1], [0], [0], [1], [0, 0, 1, 1], [], []>} : vector<8x128xf32>, vector<128x384xf32>, vector<8x384xf32> -> vector<8x384xf32>
        %68 = arith.addf %67, %24 : vector<8x384xf32>
        %69 = vector.extract_strided_slice %65 {offsets = [0, 0], sizes = [8, 256], strides = [1, 1]} : vector<8x384xf32> to vector<8x256xf32>
        %70 = vector.extract_strided_slice %68 {offsets = [0, 0], sizes = [8, 256], strides = [1, 1]} : vector<8x384xf32> to vector<8x256xf32>
        %71 = arith.addf %69, %70 : vector<8x256xf32>
        %72 = arith.negf %71 : vector<8x256xf32>
        %73 = math.exp %72 : vector<8x256xf32>
        %cst_33 = arith.constant 1.000000e+00 : f32
        %74 = vector.broadcast %cst_33 : f32 to vector<8x256xf32>
        %75 = arith.addf %74, %73 : vector<8x256xf32>
        %76 = arith.divf %74, %75 : vector<8x256xf32>
        %77 = vector.extract_strided_slice %76 {offsets = [0, 0], sizes = [8, 128], strides = [1, 1]} : vector<8x256xf32> to vector<8x128xf32>
        %78 = vector.extract_strided_slice %76 {offsets = [0, 128], sizes = [8, 128], strides = [1, 1]} : vector<8x256xf32> to vector<8x128xf32>
        %79 = vector.extract_strided_slice %65 {offsets = [0, 256], sizes = [8, 128], strides = [1, 1]} : vector<8x384xf32> to vector<8x128xf32>
        %80 = vector.extract_strided_slice %68 {offsets = [0, 256], sizes = [8, 128], strides = [1, 1]} : vector<8x384xf32> to vector<8x128xf32>
        %81 = arith.mulf %77, %80 : vector<8x128xf32>
        %82 = arith.addf %79, %81 : vector<8x128xf32>
        %83 = math.tanh %82 : vector<8x128xf32>
        %cst_34 = arith.constant 1.000000e+00 : f32
        %84 = vector.broadcast %cst_34 : f32 to vector<8x128xf32>
        %85 = arith.subf %84, %78 : vector<8x128xf32>
        %86 = arith.mulf %85, %83 : vector<8x128xf32>
        %87 = arith.mulf %78, %66 : vector<8x128xf32>
        %88 = arith.addf %86, %87 : vector<8x128xf32>
        %89 = vector.extract_strided_slice %32 {offsets = [1, 0, 0], sizes = [1, 8, 1], strides = [1, 1, 1]} : vector<8x8x1xi1> to vector<1x8x1xi1>
        %90 = vector.shape_cast %89 : vector<1x8x1xi1> to vector<8x1xi1>
        %91 = vector.shape_cast %90 : vector<8x1xi1> to vector<8x1xi1>
        %92 = vector.broadcast %91 : vector<8x1xi1> to vector<8x128xi1>
        %93 = arith.select %92, %88, %66 : vector<8x128xi1>, vector<8x128xf32>
        %c0_35 = arith.constant 0 : index
        %c0_36 = arith.constant 0 : index
        %94 = vector.load %arg13[%c0_35, %c0_36] : memref<8x128xf32, #tpu.memory_space<vmem>>, vector<8x128xf32>
        tpu.vector_store %arg13[%c0_35, %c0_36], %93 {strides = array<i32>} : memref<8x128xf32, #tpu.memory_space<vmem>>, vector<8x128xf32>,
        %cst_37 = arith.constant 0.000000e+00 : f32
        %95 = vector.shape_cast %90 : vector<8x1xi1> to vector<8x1xi1>
        %96 = vector.broadcast %95 : vector<8x1xi1> to vector<8x128xi1>
        %97 = vector.broadcast %cst_37 : f32 to vector<8x128xf32>
        %98 = arith.select %96, %88, %97 : vector<8x128xi1>, vector<8x128xf32>
        %c1 = arith.constant 1 : index
        %c0_38 = arith.constant 0 : index
        %c0_39 = arith.constant 0 : index
        %99 = vector.load %arg10[%c1, %c0_38, %c0_39] : memref<8x8x128xf32, #tpu.memory_space<vmem>>, vector<1x8x128xf32>
        %100 = vector.shape_cast %99 : vector<1x8x128xf32> to vector<8x128xf32>
        %101 = vector.shape_cast %98 : vector<8x128xf32> to vector<1x8x128xf32>
        tpu.vector_store %arg10[%c1, %c0_38, %c0_39], %101 {strides = array<i32>} : memref<8x8x128xf32, #tpu.memory_space<vmem>>, vector<1x8x128xf32>,
      } else {
      }
      %c2_i32 = arith.constant 2 : i32
      %41 = arith.addi %0, %c2_i32 : i32
      %42 = arith.cmpi slt, %41, %1 : i32
      %43 = arith.extui %42 : i1 to i32
      %c0_i32_23 = arith.constant 0 : i32
      %44 = arith.cmpi ne, %43, %c0_i32_23 : i32
      scf.if %44 {
        %c16 = arith.constant 16 : index
        %c0_29 = arith.constant 0 : index
        %65 = vector.load %arg12[%c16, %c0_29] : memref<64x384xf32, #tpu.memory_space<vmem>>, vector<8x384xf32>
        %c0_30 = arith.constant 0 : index
        %c0_31 = arith.constant 0 : index
        %66 = vector.load %arg13[%c0_30, %c0_31] : memref<8x128xf32, #tpu.memory_space<vmem>>, vector<8x128xf32>
        %cst_32 = arith.constant dense<0.000000e+00> : vector<8x384xf32>
        %67 = tpu.matmul %66, %25, %cst_32 {dimension_numbers = #tpu.dot_dimension_numbers<[1], [0], [0], [1], [0, 0, 1, 1], [], []>} : vector<8x128xf32>, vector<128x384xf32>, vector<8x384xf32> -> vector<8x384xf32>
        %68 = arith.addf %67, %24 : vector<8x384xf32>
        %69 = vector.extract_strided_slice %65 {offsets = [0, 0], sizes = [8, 256], strides = [1, 1]} : vector<8x384xf32> to vector<8x256xf32>
        %70 = vector.extract_strided_slice %68 {offsets = [0, 0], sizes = [8, 256], strides = [1, 1]} : vector<8x384xf32> to vector<8x256xf32>
        %71 = arith.addf %69, %70 : vector<8x256xf32>
        %72 = arith.negf %71 : vector<8x256xf32>
        %73 = math.exp %72 : vector<8x256xf32>
        %cst_33 = arith.constant 1.000000e+00 : f32
        %74 = vector.broadcast %cst_33 : f32 to vector<8x256xf32>
        %75 = arith.addf %74, %73 : vector<8x256xf32>
        %76 = arith.divf %74, %75 : vector<8x256xf32>
        %77 = vector.extract_strided_slice %76 {offsets = [0, 0], sizes = [8, 128], strides = [1, 1]} : vector<8x256xf32> to vector<8x128xf32>
        %78 = vector.extract_strided_slice %76 {offsets = [0, 128], sizes = [8, 128], strides = [1, 1]} : vector<8x256xf32> to vector<8x128xf32>
        %79 = vector.extract_strided_slice %65 {offsets = [0, 256], sizes = [8, 128], strides = [1, 1]} : vector<8x384xf32> to vector<8x128xf32>
        %80 = vector.extract_strided_slice %68 {offsets = [0, 256], sizes = [8, 128], strides = [1, 1]} : vector<8x384xf32> to vector<8x128xf32>
        %81 = arith.mulf %77, %80 : vector<8x128xf32>
        %82 = arith.addf %79, %81 : vector<8x128xf32>
        %83 = math.tanh %82 : vector<8x128xf32>
        %cst_34 = arith.constant 1.000000e+00 : f32
        %84 = vector.broadcast %cst_34 : f32 to vector<8x128xf32>
        %85 = arith.subf %84, %78 : vector<8x128xf32>
        %86 = arith.mulf %85, %83 : vector<8x128xf32>
        %87 = arith.mulf %78, %66 : vector<8x128xf32>
        %88 = arith.addf %86, %87 : vector<8x128xf32>
        %89 = vector.extract_strided_slice %32 {offsets = [2, 0, 0], sizes = [1, 8, 1], strides = [1, 1, 1]} : vector<8x8x1xi1> to vector<1x8x1xi1>
        %90 = vector.shape_cast %89 : vector<1x8x1xi1> to vector<8x1xi1>
        %91 = vector.shape_cast %90 : vector<8x1xi1> to vector<8x1xi1>
        %92 = vector.broadcast %91 : vector<8x1xi1> to vector<8x128xi1>
        %93 = arith.select %92, %88, %66 : vector<8x128xi1>, vector<8x128xf32>
        %c0_35 = arith.constant 0 : index
        %c0_36 = arith.constant 0 : index
        %94 = vector.load %arg13[%c0_35, %c0_36] : memref<8x128xf32, #tpu.memory_space<vmem>>, vector<8x128xf32>
        tpu.vector_store %arg13[%c0_35, %c0_36], %93 {strides = array<i32>} : memref<8x128xf32, #tpu.memory_space<vmem>>, vector<8x128xf32>,
        %cst_37 = arith.constant 0.000000e+00 : f32
        %95 = vector.shape_cast %90 : vector<8x1xi1> to vector<8x1xi1>
        %96 = vector.broadcast %95 : vector<8x1xi1> to vector<8x128xi1>
        %97 = vector.broadcast %cst_37 : f32 to vector<8x128xf32>
        %98 = arith.select %96, %88, %97 : vector<8x128xi1>, vector<8x128xf32>
        %c2 = arith.constant 2 : index
        %c0_38 = arith.constant 0 : index
        %c0_39 = arith.constant 0 : index
        %99 = vector.load %arg10[%c2, %c0_38, %c0_39] : memref<8x8x128xf32, #tpu.memory_space<vmem>>, vector<1x8x128xf32>
        %100 = vector.shape_cast %99 : vector<1x8x128xf32> to vector<8x128xf32>
        %101 = vector.shape_cast %98 : vector<8x128xf32> to vector<1x8x128xf32>
        tpu.vector_store %arg10[%c2, %c0_38, %c0_39], %101 {strides = array<i32>} : memref<8x8x128xf32, #tpu.memory_space<vmem>>, vector<1x8x128xf32>,
      } else {
      }
      %c3_i32 = arith.constant 3 : i32
      %45 = arith.addi %0, %c3_i32 : i32
      %46 = arith.cmpi slt, %45, %1 : i32
      %47 = arith.extui %46 : i1 to i32
      %c0_i32_24 = arith.constant 0 : i32
      %48 = arith.cmpi ne, %47, %c0_i32_24 : i32
      scf.if %48 {
        %c24 = arith.constant 24 : index
        %c0_29 = arith.constant 0 : index
        %65 = vector.load %arg12[%c24, %c0_29] : memref<64x384xf32, #tpu.memory_space<vmem>>, vector<8x384xf32>
        %c0_30 = arith.constant 0 : index
        %c0_31 = arith.constant 0 : index
        %66 = vector.load %arg13[%c0_30, %c0_31] : memref<8x128xf32, #tpu.memory_space<vmem>>, vector<8x128xf32>
        %cst_32 = arith.constant dense<0.000000e+00> : vector<8x384xf32>
        %67 = tpu.matmul %66, %25, %cst_32 {dimension_numbers = #tpu.dot_dimension_numbers<[1], [0], [0], [1], [0, 0, 1, 1], [], []>} : vector<8x128xf32>, vector<128x384xf32>, vector<8x384xf32> -> vector<8x384xf32>
        %68 = arith.addf %67, %24 : vector<8x384xf32>
        %69 = vector.extract_strided_slice %65 {offsets = [0, 0], sizes = [8, 256], strides = [1, 1]} : vector<8x384xf32> to vector<8x256xf32>
        %70 = vector.extract_strided_slice %68 {offsets = [0, 0], sizes = [8, 256], strides = [1, 1]} : vector<8x384xf32> to vector<8x256xf32>
        %71 = arith.addf %69, %70 : vector<8x256xf32>
        %72 = arith.negf %71 : vector<8x256xf32>
        %73 = math.exp %72 : vector<8x256xf32>
        %cst_33 = arith.constant 1.000000e+00 : f32
        %74 = vector.broadcast %cst_33 : f32 to vector<8x256xf32>
        %75 = arith.addf %74, %73 : vector<8x256xf32>
        %76 = arith.divf %74, %75 : vector<8x256xf32>
        %77 = vector.extract_strided_slice %76 {offsets = [0, 0], sizes = [8, 128], strides = [1, 1]} : vector<8x256xf32> to vector<8x128xf32>
        %78 = vector.extract_strided_slice %76 {offsets = [0, 128], sizes = [8, 128], strides = [1, 1]} : vector<8x256xf32> to vector<8x128xf32>
        %79 = vector.extract_strided_slice %65 {offsets = [0, 256], sizes = [8, 128], strides = [1, 1]} : vector<8x384xf32> to vector<8x128xf32>
        %80 = vector.extract_strided_slice %68 {offsets = [0, 256], sizes = [8, 128], strides = [1, 1]} : vector<8x384xf32> to vector<8x128xf32>
        %81 = arith.mulf %77, %80 : vector<8x128xf32>
        %82 = arith.addf %79, %81 : vector<8x128xf32>
        %83 = math.tanh %82 : vector<8x128xf32>
        %cst_34 = arith.constant 1.000000e+00 : f32
        %84 = vector.broadcast %cst_34 : f32 to vector<8x128xf32>
        %85 = arith.subf %84, %78 : vector<8x128xf32>
        %86 = arith.mulf %85, %83 : vector<8x128xf32>
        %87 = arith.mulf %78, %66 : vector<8x128xf32>
        %88 = arith.addf %86, %87 : vector<8x128xf32>
        %89 = vector.extract_strided_slice %32 {offsets = [3, 0, 0], sizes = [1, 8, 1], strides = [1, 1, 1]} : vector<8x8x1xi1> to vector<1x8x1xi1>
        %90 = vector.shape_cast %89 : vector<1x8x1xi1> to vector<8x1xi1>
        %91 = vector.shape_cast %90 : vector<8x1xi1> to vector<8x1xi1>
        %92 = vector.broadcast %91 : vector<8x1xi1> to vector<8x128xi1>
        %93 = arith.select %92, %88, %66 : vector<8x128xi1>, vector<8x128xf32>
        %c0_35 = arith.constant 0 : index
        %c0_36 = arith.constant 0 : index
        %94 = vector.load %arg13[%c0_35, %c0_36] : memref<8x128xf32, #tpu.memory_space<vmem>>, vector<8x128xf32>
        tpu.vector_store %arg13[%c0_35, %c0_36], %93 {strides = array<i32>} : memref<8x128xf32, #tpu.memory_space<vmem>>, vector<8x128xf32>,
        %cst_37 = arith.constant 0.000000e+00 : f32
        %95 = vector.shape_cast %90 : vector<8x1xi1> to vector<8x1xi1>
        %96 = vector.broadcast %95 : vector<8x1xi1> to vector<8x128xi1>
        %97 = vector.broadcast %cst_37 : f32 to vector<8x128xf32>
        %98 = arith.select %96, %88, %97 : vector<8x128xi1>, vector<8x128xf32>
        %c3 = arith.constant 3 : index
        %c0_38 = arith.constant 0 : index
        %c0_39 = arith.constant 0 : index
        %99 = vector.load %arg10[%c3, %c0_38, %c0_39] : memref<8x8x128xf32, #tpu.memory_space<vmem>>, vector<1x8x128xf32>
        %100 = vector.shape_cast %99 : vector<1x8x128xf32> to vector<8x128xf32>
        %101 = vector.shape_cast %98 : vector<8x128xf32> to vector<1x8x128xf32>
        tpu.vector_store %arg10[%c3, %c0_38, %c0_39], %101 {strides = array<i32>} : memref<8x8x128xf32, #tpu.memory_space<vmem>>, vector<1x8x128xf32>,
      } else {
      }
      %c4_i32 = arith.constant 4 : i32
      %49 = arith.addi %0, %c4_i32 : i32
      %50 = arith.cmpi slt, %49, %1 : i32
      %51 = arith.extui %50 : i1 to i32
      %c0_i32_25 = arith.constant 0 : i32
      %52 = arith.cmpi ne, %51, %c0_i32_25 : i32
      scf.if %52 {
        %c32 = arith.constant 32 : index
        %c0_29 = arith.constant 0 : index
        %65 = vector.load %arg12[%c32, %c0_29] : memref<64x384xf32, #tpu.memory_space<vmem>>, vector<8x384xf32>
        %c0_30 = arith.constant 0 : index
        %c0_31 = arith.constant 0 : index
        %66 = vector.load %arg13[%c0_30, %c0_31] : memref<8x128xf32, #tpu.memory_space<vmem>>, vector<8x128xf32>
        %cst_32 = arith.constant dense<0.000000e+00> : vector<8x384xf32>
        %67 = tpu.matmul %66, %25, %cst_32 {dimension_numbers = #tpu.dot_dimension_numbers<[1], [0], [0], [1], [0, 0, 1, 1], [], []>} : vector<8x128xf32>, vector<128x384xf32>, vector<8x384xf32> -> vector<8x384xf32>
        %68 = arith.addf %67, %24 : vector<8x384xf32>
        %69 = vector.extract_strided_slice %65 {offsets = [0, 0], sizes = [8, 256], strides = [1, 1]} : vector<8x384xf32> to vector<8x256xf32>
        %70 = vector.extract_strided_slice %68 {offsets = [0, 0], sizes = [8, 256], strides = [1, 1]} : vector<8x384xf32> to vector<8x256xf32>
        %71 = arith.addf %69, %70 : vector<8x256xf32>
        %72 = arith.negf %71 : vector<8x256xf32>
        %73 = math.exp %72 : vector<8x256xf32>
        %cst_33 = arith.constant 1.000000e+00 : f32
        %74 = vector.broadcast %cst_33 : f32 to vector<8x256xf32>
        %75 = arith.addf %74, %73 : vector<8x256xf32>
        %76 = arith.divf %74, %75 : vector<8x256xf32>
        %77 = vector.extract_strided_slice %76 {offsets = [0, 0], sizes = [8, 128], strides = [1, 1]} : vector<8x256xf32> to vector<8x128xf32>
        %78 = vector.extract_strided_slice %76 {offsets = [0, 128], sizes = [8, 128], strides = [1, 1]} : vector<8x256xf32> to vector<8x128xf32>
        %79 = vector.extract_strided_slice %65 {offsets = [0, 256], sizes = [8, 128], strides = [1, 1]} : vector<8x384xf32> to vector<8x128xf32>
        %80 = vector.extract_strided_slice %68 {offsets = [0, 256], sizes = [8, 128], strides = [1, 1]} : vector<8x384xf32> to vector<8x128xf32>
        %81 = arith.mulf %77, %80 : vector<8x128xf32>
        %82 = arith.addf %79, %81 : vector<8x128xf32>
        %83 = math.tanh %82 : vector<8x128xf32>
        %cst_34 = arith.constant 1.000000e+00 : f32
        %84 = vector.broadcast %cst_34 : f32 to vector<8x128xf32>
        %85 = arith.subf %84, %78 : vector<8x128xf32>
        %86 = arith.mulf %85, %83 : vector<8x128xf32>
        %87 = arith.mulf %78, %66 : vector<8x128xf32>
        %88 = arith.addf %86, %87 : vector<8x128xf32>
        %89 = vector.extract_strided_slice %32 {offsets = [4, 0, 0], sizes = [1, 8, 1], strides = [1, 1, 1]} : vector<8x8x1xi1> to vector<1x8x1xi1>
        %90 = vector.shape_cast %89 : vector<1x8x1xi1> to vector<8x1xi1>
        %91 = vector.shape_cast %90 : vector<8x1xi1> to vector<8x1xi1>
        %92 = vector.broadcast %91 : vector<8x1xi1> to vector<8x128xi1>
        %93 = arith.select %92, %88, %66 : vector<8x128xi1>, vector<8x128xf32>
        %c0_35 = arith.constant 0 : index
        %c0_36 = arith.constant 0 : index
        %94 = vector.load %arg13[%c0_35, %c0_36] : memref<8x128xf32, #tpu.memory_space<vmem>>, vector<8x128xf32>
        tpu.vector_store %arg13[%c0_35, %c0_36], %93 {strides = array<i32>} : memref<8x128xf32, #tpu.memory_space<vmem>>, vector<8x128xf32>,
        %cst_37 = arith.constant 0.000000e+00 : f32
        %95 = vector.shape_cast %90 : vector<8x1xi1> to vector<8x1xi1>
        %96 = vector.broadcast %95 : vector<8x1xi1> to vector<8x128xi1>
        %97 = vector.broadcast %cst_37 : f32 to vector<8x128xf32>
        %98 = arith.select %96, %88, %97 : vector<8x128xi1>, vector<8x128xf32>
        %c4 = arith.constant 4 : index
        %c0_38 = arith.constant 0 : index
        %c0_39 = arith.constant 0 : index
        %99 = vector.load %arg10[%c4, %c0_38, %c0_39] : memref<8x8x128xf32, #tpu.memory_space<vmem>>, vector<1x8x128xf32>
        %100 = vector.shape_cast %99 : vector<1x8x128xf32> to vector<8x128xf32>
        %101 = vector.shape_cast %98 : vector<8x128xf32> to vector<1x8x128xf32>
        tpu.vector_store %arg10[%c4, %c0_38, %c0_39], %101 {strides = array<i32>} : memref<8x8x128xf32, #tpu.memory_space<vmem>>, vector<1x8x128xf32>,
      } else {
      }
      %c5_i32 = arith.constant 5 : i32
      %53 = arith.addi %0, %c5_i32 : i32
      %54 = arith.cmpi slt, %53, %1 : i32
      %55 = arith.extui %54 : i1 to i32
      %c0_i32_26 = arith.constant 0 : i32
      %56 = arith.cmpi ne, %55, %c0_i32_26 : i32
      scf.if %56 {
        %c40 = arith.constant 40 : index
        %c0_29 = arith.constant 0 : index
        %65 = vector.load %arg12[%c40, %c0_29] : memref<64x384xf32, #tpu.memory_space<vmem>>, vector<8x384xf32>
        %c0_30 = arith.constant 0 : index
        %c0_31 = arith.constant 0 : index
        %66 = vector.load %arg13[%c0_30, %c0_31] : memref<8x128xf32, #tpu.memory_space<vmem>>, vector<8x128xf32>
        %cst_32 = arith.constant dense<0.000000e+00> : vector<8x384xf32>
        %67 = tpu.matmul %66, %25, %cst_32 {dimension_numbers = #tpu.dot_dimension_numbers<[1], [0], [0], [1], [0, 0, 1, 1], [], []>} : vector<8x128xf32>, vector<128x384xf32>, vector<8x384xf32> -> vector<8x384xf32>
        %68 = arith.addf %67, %24 : vector<8x384xf32>
        %69 = vector.extract_strided_slice %65 {offsets = [0, 0], sizes = [8, 256], strides = [1, 1]} : vector<8x384xf32> to vector<8x256xf32>
        %70 = vector.extract_strided_slice %68 {offsets = [0, 0], sizes = [8, 256], strides = [1, 1]} : vector<8x384xf32> to vector<8x256xf32>
        %71 = arith.addf %69, %70 : vector<8x256xf32>
        %72 = arith.negf %71 : vector<8x256xf32>
        %73 = math.exp %72 : vector<8x256xf32>
        %cst_33 = arith.constant 1.000000e+00 : f32
        %74 = vector.broadcast %cst_33 : f32 to vector<8x256xf32>
        %75 = arith.addf %74, %73 : vector<8x256xf32>
        %76 = arith.divf %74, %75 : vector<8x256xf32>
        %77 = vector.extract_strided_slice %76 {offsets = [0, 0], sizes = [8, 128], strides = [1, 1]} : vector<8x256xf32> to vector<8x128xf32>
        %78 = vector.extract_strided_slice %76 {offsets = [0, 128], sizes = [8, 128], strides = [1, 1]} : vector<8x256xf32> to vector<8x128xf32>
        %79 = vector.extract_strided_slice %65 {offsets = [0, 256], sizes = [8, 128], strides = [1, 1]} : vector<8x384xf32> to vector<8x128xf32>
        %80 = vector.extract_strided_slice %68 {offsets = [0, 256], sizes = [8, 128], strides = [1, 1]} : vector<8x384xf32> to vector<8x128xf32>
        %81 = arith.mulf %77, %80 : vector<8x128xf32>
        %82 = arith.addf %79, %81 : vector<8x128xf32>
        %83 = math.tanh %82 : vector<8x128xf32>
        %cst_34 = arith.constant 1.000000e+00 : f32
        %84 = vector.broadcast %cst_34 : f32 to vector<8x128xf32>
        %85 = arith.subf %84, %78 : vector<8x128xf32>
        %86 = arith.mulf %85, %83 : vector<8x128xf32>
        %87 = arith.mulf %78, %66 : vector<8x128xf32>
        %88 = arith.addf %86, %87 : vector<8x128xf32>
        %89 = vector.extract_strided_slice %32 {offsets = [5, 0, 0], sizes = [1, 8, 1], strides = [1, 1, 1]} : vector<8x8x1xi1> to vector<1x8x1xi1>
        %90 = vector.shape_cast %89 : vector<1x8x1xi1> to vector<8x1xi1>
        %91 = vector.shape_cast %90 : vector<8x1xi1> to vector<8x1xi1>
        %92 = vector.broadcast %91 : vector<8x1xi1> to vector<8x128xi1>
        %93 = arith.select %92, %88, %66 : vector<8x128xi1>, vector<8x128xf32>
        %c0_35 = arith.constant 0 : index
        %c0_36 = arith.constant 0 : index
        %94 = vector.load %arg13[%c0_35, %c0_36] : memref<8x128xf32, #tpu.memory_space<vmem>>, vector<8x128xf32>
        tpu.vector_store %arg13[%c0_35, %c0_36], %93 {strides = array<i32>} : memref<8x128xf32, #tpu.memory_space<vmem>>, vector<8x128xf32>,
        %cst_37 = arith.constant 0.000000e+00 : f32
        %95 = vector.shape_cast %90 : vector<8x1xi1> to vector<8x1xi1>
        %96 = vector.broadcast %95 : vector<8x1xi1> to vector<8x128xi1>
        %97 = vector.broadcast %cst_37 : f32 to vector<8x128xf32>
        %98 = arith.select %96, %88, %97 : vector<8x128xi1>, vector<8x128xf32>
        %c5 = arith.constant 5 : index
        %c0_38 = arith.constant 0 : index
        %c0_39 = arith.constant 0 : index
        %99 = vector.load %arg10[%c5, %c0_38, %c0_39] : memref<8x8x128xf32, #tpu.memory_space<vmem>>, vector<1x8x128xf32>
        %100 = vector.shape_cast %99 : vector<1x8x128xf32> to vector<8x128xf32>
        %101 = vector.shape_cast %98 : vector<8x128xf32> to vector<1x8x128xf32>
        tpu.vector_store %arg10[%c5, %c0_38, %c0_39], %101 {strides = array<i32>} : memref<8x8x128xf32, #tpu.memory_space<vmem>>, vector<1x8x128xf32>,
      } else {
      }
      %c6_i32 = arith.constant 6 : i32
      %57 = arith.addi %0, %c6_i32 : i32
      %58 = arith.cmpi slt, %57, %1 : i32
      %59 = arith.extui %58 : i1 to i32
      %c0_i32_27 = arith.constant 0 : i32
      %60 = arith.cmpi ne, %59, %c0_i32_27 : i32
      scf.if %60 {
        %c48 = arith.constant 48 : index
        %c0_29 = arith.constant 0 : index
        %65 = vector.load %arg12[%c48, %c0_29] : memref<64x384xf32, #tpu.memory_space<vmem>>, vector<8x384xf32>
        %c0_30 = arith.constant 0 : index
        %c0_31 = arith.constant 0 : index
        %66 = vector.load %arg13[%c0_30, %c0_31] : memref<8x128xf32, #tpu.memory_space<vmem>>, vector<8x128xf32>
        %cst_32 = arith.constant dense<0.000000e+00> : vector<8x384xf32>
        %67 = tpu.matmul %66, %25, %cst_32 {dimension_numbers = #tpu.dot_dimension_numbers<[1], [0], [0], [1], [0, 0, 1, 1], [], []>} : vector<8x128xf32>, vector<128x384xf32>, vector<8x384xf32> -> vector<8x384xf32>
        %68 = arith.addf %67, %24 : vector<8x384xf32>
        %69 = vector.extract_strided_slice %65 {offsets = [0, 0], sizes = [8, 256], strides = [1, 1]} : vector<8x384xf32> to vector<8x256xf32>
        %70 = vector.extract_strided_slice %68 {offsets = [0, 0], sizes = [8, 256], strides = [1, 1]} : vector<8x384xf32> to vector<8x256xf32>
        %71 = arith.addf %69, %70 : vector<8x256xf32>
        %72 = arith.negf %71 : vector<8x256xf32>
        %73 = math.exp %72 : vector<8x256xf32>
        %cst_33 = arith.constant 1.000000e+00 : f32
        %74 = vector.broadcast %cst_33 : f32 to vector<8x256xf32>
        %75 = arith.addf %74, %73 : vector<8x256xf32>
        %76 = arith.divf %74, %75 : vector<8x256xf32>
        %77 = vector.extract_strided_slice %76 {offsets = [0, 0], sizes = [8, 128], strides = [1, 1]} : vector<8x256xf32> to vector<8x128xf32>
        %78 = vector.extract_strided_slice %76 {offsets = [0, 128], sizes = [8, 128], strides = [1, 1]} : vector<8x256xf32> to vector<8x128xf32>
        %79 = vector.extract_strided_slice %65 {offsets = [0, 256], sizes = [8, 128], strides = [1, 1]} : vector<8x384xf32> to vector<8x128xf32>
        %80 = vector.extract_strided_slice %68 {offsets = [0, 256], sizes = [8, 128], strides = [1, 1]} : vector<8x384xf32> to vector<8x128xf32>
        %81 = arith.mulf %77, %80 : vector<8x128xf32>
        %82 = arith.addf %79, %81 : vector<8x128xf32>
        %83 = math.tanh %82 : vector<8x128xf32>
        %cst_34 = arith.constant 1.000000e+00 : f32
        %84 = vector.broadcast %cst_34 : f32 to vector<8x128xf32>
        %85 = arith.subf %84, %78 : vector<8x128xf32>
        %86 = arith.mulf %85, %83 : vector<8x128xf32>
        %87 = arith.mulf %78, %66 : vector<8x128xf32>
        %88 = arith.addf %86, %87 : vector<8x128xf32>
        %89 = vector.extract_strided_slice %32 {offsets = [6, 0, 0], sizes = [1, 8, 1], strides = [1, 1, 1]} : vector<8x8x1xi1> to vector<1x8x1xi1>
        %90 = vector.shape_cast %89 : vector<1x8x1xi1> to vector<8x1xi1>
        %91 = vector.shape_cast %90 : vector<8x1xi1> to vector<8x1xi1>
        %92 = vector.broadcast %91 : vector<8x1xi1> to vector<8x128xi1>
        %93 = arith.select %92, %88, %66 : vector<8x128xi1>, vector<8x128xf32>
        %c0_35 = arith.constant 0 : index
        %c0_36 = arith.constant 0 : index
        %94 = vector.load %arg13[%c0_35, %c0_36] : memref<8x128xf32, #tpu.memory_space<vmem>>, vector<8x128xf32>
        tpu.vector_store %arg13[%c0_35, %c0_36], %93 {strides = array<i32>} : memref<8x128xf32, #tpu.memory_space<vmem>>, vector<8x128xf32>,
        %cst_37 = arith.constant 0.000000e+00 : f32
        %95 = vector.shape_cast %90 : vector<8x1xi1> to vector<8x1xi1>
        %96 = vector.broadcast %95 : vector<8x1xi1> to vector<8x128xi1>
        %97 = vector.broadcast %cst_37 : f32 to vector<8x128xf32>
        %98 = arith.select %96, %88, %97 : vector<8x128xi1>, vector<8x128xf32>
        %c6 = arith.constant 6 : index
        %c0_38 = arith.constant 0 : index
        %c0_39 = arith.constant 0 : index
        %99 = vector.load %arg10[%c6, %c0_38, %c0_39] : memref<8x8x128xf32, #tpu.memory_space<vmem>>, vector<1x8x128xf32>
        %100 = vector.shape_cast %99 : vector<1x8x128xf32> to vector<8x128xf32>
        %101 = vector.shape_cast %98 : vector<8x128xf32> to vector<1x8x128xf32>
        tpu.vector_store %arg10[%c6, %c0_38, %c0_39], %101 {strides = array<i32>} : memref<8x8x128xf32, #tpu.memory_space<vmem>>, vector<1x8x128xf32>,
      } else {
      }
      %c7_i32 = arith.constant 7 : i32
      %61 = arith.addi %0, %c7_i32 : i32
      %62 = arith.cmpi slt, %61, %1 : i32
      %63 = arith.extui %62 : i1 to i32
      %c0_i32_28 = arith.constant 0 : i32
      %64 = arith.cmpi ne, %63, %c0_i32_28 : i32
      scf.if %64 {
        %c56 = arith.constant 56 : index
        %c0_29 = arith.constant 0 : index
        %65 = vector.load %arg12[%c56, %c0_29] : memref<64x384xf32, #tpu.memory_space<vmem>>, vector<8x384xf32>
        %c0_30 = arith.constant 0 : index
        %c0_31 = arith.constant 0 : index
        %66 = vector.load %arg13[%c0_30, %c0_31] : memref<8x128xf32, #tpu.memory_space<vmem>>, vector<8x128xf32>
        %cst_32 = arith.constant dense<0.000000e+00> : vector<8x384xf32>
        %67 = tpu.matmul %66, %25, %cst_32 {dimension_numbers = #tpu.dot_dimension_numbers<[1], [0], [0], [1], [0, 0, 1, 1], [], []>} : vector<8x128xf32>, vector<128x384xf32>, vector<8x384xf32> -> vector<8x384xf32>
        %68 = arith.addf %67, %24 : vector<8x384xf32>
        %69 = vector.extract_strided_slice %65 {offsets = [0, 0], sizes = [8, 256], strides = [1, 1]} : vector<8x384xf32> to vector<8x256xf32>
        %70 = vector.extract_strided_slice %68 {offsets = [0, 0], sizes = [8, 256], strides = [1, 1]} : vector<8x384xf32> to vector<8x256xf32>
        %71 = arith.addf %69, %70 : vector<8x256xf32>
        %72 = arith.negf %71 : vector<8x256xf32>
        %73 = math.exp %72 : vector<8x256xf32>
        %cst_33 = arith.constant 1.000000e+00 : f32
        %74 = vector.broadcast %cst_33 : f32 to vector<8x256xf32>
        %75 = arith.addf %74, %73 : vector<8x256xf32>
        %76 = arith.divf %74, %75 : vector<8x256xf32>
        %77 = vector.extract_strided_slice %76 {offsets = [0, 0], sizes = [8, 128], strides = [1, 1]} : vector<8x256xf32> to vector<8x128xf32>
        %78 = vector.extract_strided_slice %76 {offsets = [0, 128], sizes = [8, 128], strides = [1, 1]} : vector<8x256xf32> to vector<8x128xf32>
        %79 = vector.extract_strided_slice %65 {offsets = [0, 256], sizes = [8, 128], strides = [1, 1]} : vector<8x384xf32> to vector<8x128xf32>
        %80 = vector.extract_strided_slice %68 {offsets = [0, 256], sizes = [8, 128], strides = [1, 1]} : vector<8x384xf32> to vector<8x128xf32>
        %81 = arith.mulf %77, %80 : vector<8x128xf32>
        %82 = arith.addf %79, %81 : vector<8x128xf32>
        %83 = math.tanh %82 : vector<8x128xf32>
        %cst_34 = arith.constant 1.000000e+00 : f32
        %84 = vector.broadcast %cst_34 : f32 to vector<8x128xf32>
        %85 = arith.subf %84, %78 : vector<8x128xf32>
        %86 = arith.mulf %85, %83 : vector<8x128xf32>
        %87 = arith.mulf %78, %66 : vector<8x128xf32>
        %88 = arith.addf %86, %87 : vector<8x128xf32>
        %89 = vector.extract_strided_slice %32 {offsets = [7, 0, 0], sizes = [1, 8, 1], strides = [1, 1, 1]} : vector<8x8x1xi1> to vector<1x8x1xi1>
        %90 = vector.shape_cast %89 : vector<1x8x1xi1> to vector<8x1xi1>
        %91 = vector.shape_cast %90 : vector<8x1xi1> to vector<8x1xi1>
        %92 = vector.broadcast %91 : vector<8x1xi1> to vector<8x128xi1>
        %93 = arith.select %92, %88, %66 : vector<8x128xi1>, vector<8x128xf32>
        %c0_35 = arith.constant 0 : index
        %c0_36 = arith.constant 0 : index
        %94 = vector.load %arg13[%c0_35, %c0_36] : memref<8x128xf32, #tpu.memory_space<vmem>>, vector<8x128xf32>
        tpu.vector_store %arg13[%c0_35, %c0_36], %93 {strides = array<i32>} : memref<8x128xf32, #tpu.memory_space<vmem>>, vector<8x128xf32>,
        %cst_37 = arith.constant 0.000000e+00 : f32
        %95 = vector.shape_cast %90 : vector<8x1xi1> to vector<8x1xi1>
        %96 = vector.broadcast %95 : vector<8x1xi1> to vector<8x128xi1>
        %97 = vector.broadcast %cst_37 : f32 to vector<8x128xf32>
        %98 = arith.select %96, %88, %97 : vector<8x128xi1>, vector<8x128xf32>
        %c7 = arith.constant 7 : index
        %c0_38 = arith.constant 0 : index
        %c0_39 = arith.constant 0 : index
        %99 = vector.load %arg10[%c7, %c0_38, %c0_39] : memref<8x8x128xf32, #tpu.memory_space<vmem>>, vector<1x8x128xf32>
        %100 = vector.shape_cast %99 : vector<1x8x128xf32> to vector<8x128xf32>
        %101 = vector.shape_cast %98 : vector<8x128xf32> to vector<1x8x128xf32>
        tpu.vector_store %arg10[%c7, %c0_38, %c0_39], %101 {strides = array<i32>} : memref<8x8x128xf32, #tpu.memory_space<vmem>>, vector<1x8x128xf32>,
      } else {
      }
    } else {
    }
    %c0_i32_4 = arith.constant 0 : i32
    %12 = arith.cmpi eq, %arg0, %c0_i32_4 : i32
    %13 = arith.extui %12 : i1 to i32
    %c0_i32_5 = arith.constant 0 : i32
    %14 = arith.cmpi ne, %13, %c0_i32_5 : i32
    scf.if %14 {
      %c0_6 = arith.constant 0 : index
      %c0_7 = arith.constant 0 : index
      %15 = vector.load %arg13[%c0_6, %c0_7] : memref<8x128xf32, #tpu.memory_space<vmem>>, vector<8x128xf32>
      %c0_8 = arith.constant 0 : index
      %c0_9 = arith.constant 0 : index
      %16 = vector.load %arg8[%c0_8, %c0_9] : memref<128x128xf32, #tpu.memory_space<vmem>>, vector<128x128xf32>
      %cst = arith.constant dense<0.000000e+00> : vector<8x128xf32>
      %17 = tpu.matmul %15, %16, %cst {dimension_numbers = #tpu.dot_dimension_numbers<[1], [0], [0], [1], [0, 0, 1, 1], [], []>} : vector<8x128xf32>, vector<128x128xf32>, vector<8x128xf32> -> vector<8x128xf32>
      %c0_10 = arith.constant 0 : index
      %c0_11 = arith.constant 0 : index
      %18 = vector.load %arg9[%c0_10, %c0_11] : memref<1x128xf32, #tpu.memory_space<vmem>>, vector<1x128xf32>
      %19 = vector.broadcast %18 : vector<1x128xf32> to vector<8x128xf32>
      %20 = arith.addf %17, %19 : vector<8x128xf32>
      %21 = math.tanh %20 : vector<8x128xf32>
      %c0_12 = arith.constant 0 : index
      %c0_13 = arith.constant 0 : index
      %22 = vector.load %arg11[%c0_12, %c0_13] : memref<8x128xf32, #tpu.memory_space<vmem>>, vector<8x128xf32>
      tpu.vector_store %arg11[%c0_12, %c0_13], %21 {strides = array<i32>} : memref<8x128xf32, #tpu.memory_space<vmem>>, vector<8x128xf32>,
    } else {
    }
    return
  }
  func.func @transform_0(%arg0: i32, %arg1: memref<1xi32, #tpu.memory_space<smem>>) -> (i32, i32) {
    %c0_i32 = arith.constant 0 : i32
    %c0_i32_0 = arith.constant 0 : i32
    %c0_i32_1 = arith.constant 0 : i32
    return %c0_i32, %c0_i32_0 : i32, i32
  }
  func.func @transform_1(%arg0: i32, %arg1: memref<1xi32, #tpu.memory_space<smem>>) -> (i32, i32) {
    %c0_i32 = arith.constant 0 : i32
    %c0_i32_0 = arith.constant 0 : i32
    return %arg0, %c0_i32 : i32, i32
  }
  func.func @transform_2(%arg0: i32, %arg1: memref<1xi32, #tpu.memory_space<smem>>) -> (i32, i32) {
    %c0_i32 = arith.constant 0 : i32
    %c0_i32_0 = arith.constant 0 : i32
    %c0_i32_1 = arith.constant 0 : i32
    return %c0_i32, %c0_i32_0 : i32, i32
  }
  func.func @transform_3(%arg0: i32, %arg1: memref<1xi32, #tpu.memory_space<smem>>) -> (i32, i32) {
    %c0_i32 = arith.constant 0 : i32
    %c0_i32_0 = arith.constant 0 : i32
    %c0_i32_1 = arith.constant 0 : i32
    return %c0_i32, %c0_i32_0 : i32, i32
  }
  func.func @transform_4(%arg0: i32, %arg1: memref<1xi32, #tpu.memory_space<smem>>) -> (i32, i32) {
    %c0_i32 = arith.constant 0 : i32
    %c0_i32_0 = arith.constant 0 : i32
    %c0_i32_1 = arith.constant 0 : i32
    return %c0_i32, %c0_i32_0 : i32, i32
  }
  func.func @transform_5(%arg0: i32, %arg1: memref<1xi32, #tpu.memory_space<smem>>) -> (i32, i32) {
    %c0_i32 = arith.constant 0 : i32
    %c0_i32_0 = arith.constant 0 : i32
    %c0_i32_1 = arith.constant 0 : i32
    return %c0_i32, %c0_i32_0 : i32, i32
  }
  func.func @transform_6(%arg0: i32, %arg1: memref<1xi32, #tpu.memory_space<smem>>) -> (i32, i32) {
    %c0_i32 = arith.constant 0 : i32
    %c0_i32_0 = arith.constant 0 : i32
    %c0_i32_1 = arith.constant 0 : i32
    return %c0_i32, %c0_i32_0 : i32, i32
  }
  func.func @transform_7(%arg0: i32, %arg1: memref<1xi32, #tpu.memory_space<smem>>) -> (i32, i32) {
    %c0_i32 = arith.constant 0 : i32
    %c0_i32_0 = arith.constant 0 : i32
    %c0_i32_1 = arith.constant 0 : i32
    return %c0_i32, %c0_i32_0 : i32, i32
  }
  func.func @transform_8(%arg0: i32, %arg1: memref<1xi32, #tpu.memory_space<smem>>) -> (i32, i32, i32) {
    %c0_i32 = arith.constant 0 : i32
    %c0_i32_0 = arith.constant 0 : i32
    %c0_i32_1 = arith.constant 0 : i32
    return %arg0, %c0_i32, %c0_i32_0 : i32, i32, i32
  }
  func.func @transform_9(%arg0: i32, %arg1: memref<1xi32, #tpu.memory_space<smem>>) -> (i32, i32) {
    %c0_i32 = arith.constant 0 : i32
    %c0_i32_0 = arith.constant 0 : i32
    %c0_i32_1 = arith.constant 0 : i32
    return %c0_i32, %c0_i32_0 : i32, i32
  }
}

</mosaic_0001>

<bundles_post_ra>
// kernel: tpu_custom_call.1
= control target key start
LH: loop header
LB: loop body
LE: loop exit
PB: predicated region body
PF: predicated region fallthrough
CT: control target
= control target key end

     0   :  { %17 = vsyncpa [#allocation7], 0  ;;  %s4095_s0 = inlined_call_operand.<no memory space> [shape: s32[1], index: 0, kind: input, shape index: {}]   ;;  %s4096_s1 = inlined_call_operand.vmem [shape: s32[8,1], index: 1, kind: input, shape index: {}]   ;;  %s4097_s2 = inlined_call_operand.hbm [shape: f32[64,128], index: 2, kind: input, shape index: {}]   ;;  %s4098_s3 = inlined_call_operand.hbm [shape: f32[128,384], index: 3, kind: input, shape index: {}]   ;;  %s4099_s4 = inlined_call_operand.vmem [shape: f32[1,384], index: 4, kind: input, shape index: {}]   ;;  %s4100_s5 = inlined_call_operand.hbm [shape: f32[128,384], index: 5, kind: input, shape index: {}]   ;;  %s4101_s6 = inlined_call_operand.vmem [shape: f32[1,384], index: 6, kind: input, shape index: {}]   ;;  %s4102_s7 = inlined_call_operand.hbm [shape: f32[128,128], index: 7, kind: input, shape index: {}]   ;;  %s4103_s8 = inlined_call_operand.vmem [shape: f32[1,128], index: 8, kind: input, shape index: {}]   ;;  %s4104_s9 = inlined_call_operand.hbm [shape: f32[8,8,128], index: 9, kind: output, shape index: {0}]   ;;  %s4105_s10 = inlined_call_operand.hbm [shape: f32[8,128], index: 10, kind: output, shape index: {1}]  }
   0x1   :  { %18 = vsyncpa [#allocation10], 0 }
   0x2   :  { %19 = vsyncpa [#allocation13], 0 }
   0x3   :  { %20 = vsyncpa [#allocation8], 0 }
   0x4   :  { %21 = vsyncpa [#allocation16], 0  ;;  %s3492_s13 = smov [#allocation9]   ;;  %s3350_s17 = scalar_lea.hbm %s4098_s3, 6144 }
   0x5   :  { %s41_s14 = sshll.u32 %s3492_s13, 4  ;;  %p3351_p0 = scmp.ne.s32.totalorder %s4098_s3, %s3350_s17  ;;  %s42_s14 = int_to_ptr.vmem [resolvable:$true] %s41_s14 }
   0x6   :  { %p3354_p1 = scmp.lt.u32.totalorder %s3350_s17, %s4098_s3 }
   0x8   :  { %p3356_p2 = pnand %p3354_p1, %p3351_p0 }
   0xa   :  { %3359 = shalt.err (!%p3356_p2)
}
   0xb   :  { %s3360_s22 = scalar_lea.vmem %s42_s14, 6144  ;;  %p3365_p4 = scmp.lt.s32.totalorder %s42_s14, %s42_s14 }
   0xc   :  { %p3361_p3 = scmp.ne.s32.totalorder %s42_s14, %s3360_s22  ;;  %p3366_p5 = scmp.lt.s32.totalorder %s3360_s22, %s3360_s22 }
   0xe   :  { %p3367_p6 = por %p3366_p5, %p3365_p4 }
  0x10   :  { %p3368_p7 = pnand %p3367_p6, %p3361_p3 }
  0x12   :  { %3371 = shalt.err (!%p3368_p7)
}
  0x13   :  { %s3493_s23 = smov 384   ;;  %s3494_s24 = smov 24  }
  0x14   :  { %47 = dma.hbm_to_vmem [thread:$0]  %s4098_s3, 6144, %s42_s14, [#allocation10], %s3493_s23, %s3493_s23, %s3494_s24  }
  0x15   :  { %s3495_s27 = smov [#allocation6]   ;;  %s3372_s11 = scalar_lea.hbm %s4097_s2, 1024 }
  0x16   :  { %s29_s28 = sshll.u32 %s3495_s27, 4  ;;  %p3373_p8 = scmp.ne.s32.totalorder %s4097_s2, %s3372_s11  ;;  %s30_s28 = int_to_ptr.vmem [resolvable:$true] %s29_s28 }
  0x17   :  { %p3376_p9 = scmp.lt.u32.totalorder %s3372_s11, %s4097_s2 }
  0x19   :  { %p3378_p10 = pnand %p3376_p9, %p3373_p8 }
  0x1b   :  { %3381 = shalt.err (!%p3378_p10)
}
  0x1c   :  { %s3382_s17 = scalar_lea.vmem %s30_s28, 1024  ;;  %p3387_p12 = scmp.lt.s32.totalorder %s30_s28, %s30_s28 }
  0x1d   :  { %p3383_p11 = scmp.ne.s32.totalorder %s30_s28, %s3382_s17  ;;  %p3388_p13 = scmp.lt.s32.totalorder %s3382_s17, %s3382_s17 }
  0x1f   :  { %p3389_p0 = por %p3388_p13, %p3387_p12 }
  0x21   :  { %p3390_p1 = pnand %p3389_p0, %p3383_p11 }
  0x23   :  { %3393 = shalt.err (!%p3390_p1)
}
  0x24   :  { %s3496_s3 = smov 128   ;;  %s3497_s14 = smov 8  }
  0x25   :  { %35 = dma.hbm_to_vmem [thread:$0]  %s4097_s2, 1024, %s30_s28, [#allocation7], %s3496_s3, %s3496_s3, %s3497_s14  }
  0x26   :  { %s3498_s20 = smov [#allocation11]   ;;  %s3499_s22 = smov [#allocation12]  }
  0x27   :  { %s55_s21 = sshll.u32 %s3498_s20, 4  ;;  %s69_s25 = sshll.u32 %s3499_s22, 4  ;;  %s56_s21 = int_to_ptr.vmem [resolvable:$true] %s55_s21  ;;  %s3623_s25 = int_to_ptr.vmem [resolvable:$true] %s69_s25 }
  0x28   :  { %s3394_s29 = scalar_lea.hbm %s4100_s5, 6144 }
  0x29   :  { %p3395_p2 = scmp.ne.s32.totalorder %s4100_s5, %s3394_s29  ;;  %p3398_p3 = scmp.lt.u32.totalorder %s3394_s29, %s4100_s5 }
  0x2b   :  { %p3400_p4 = pnand %p3398_p3, %p3395_p2 }
  0x2d   :  { %3403 = shalt.err (!%p3400_p4)
}
  0x2e   :  { %s3404_s2 = scalar_lea.vmem %s56_s21, 6144  ;;  %p3409_p6 = scmp.lt.s32.totalorder %s56_s21, %s56_s21 }
  0x2f   :  { %p3405_p5 = scmp.ne.s32.totalorder %s56_s21, %s3404_s2  ;;  %p3410_p7 = scmp.lt.s32.totalorder %s3404_s2, %s3404_s2 }
  0x31   :  { %p3411_p8 = por %p3410_p7, %p3409_p6 }
  0x33   :  { %p3412_p9 = pnand %p3411_p8, %p3405_p5 }
  0x35   :  { %3415 = shalt.err (!%p3412_p9)
}
  0x36   :  { %61 = dma.hbm_to_vmem [thread:$0]  %s4100_s5, 6144, %s56_s21, [#allocation10], %s3493_s23, %s3493_s23, %s3494_s24  }
  0x37   :  { %s3416_s18 = scalar_lea.hbm %s4102_s7, 2048 }
  0x38   :  { %p3417_p10 = scmp.ne.s32.totalorder %s4102_s7, %s3416_s18  ;;  %p3420_p11 = scmp.lt.u32.totalorder %s3416_s18, %s4102_s7 }
  0x3a   :  { %p3422_p12 = pnand %p3420_p11, %p3417_p10 }
  0x3c   :  { %3425 = shalt.err (!%p3422_p12)
}
  0x3d   :  { %s3426_s27 = scalar_lea.vmem %s3623_s25, 2048  ;;  %p3431_p0 = scmp.lt.s32.totalorder %s3623_s25, %s3623_s25 }
  0x3e   :  { %p3427_p13 = scmp.ne.s32.totalorder %s3623_s25, %s3426_s27  ;;  %p3432_p1 = scmp.lt.s32.totalorder %s3426_s27, %s3426_s27 }
  0x40   :  { %p3433_p2 = por %p3432_p1, %p3431_p0 }
  0x42   :  { %p3434_p3 = pnand %p3433_p2, %p3427_p13 }
  0x44   :  { %3437 = shalt.err (!%p3434_p3)
}
  0x45   :  { %75 = dma.hbm_to_vmem [thread:$0]  %s4102_s7, 2048, %s3623_s25, [#allocation13], %s3496_s3, %s3496_s3, %s3497_s14  }
  0x46   :  { %3482 = dma.done.wait [#allocation7], 1024  }
  0x47   :  { %3483 = vsyncadd [#allocation7], 4294966272 }
  0x48   :  { %3484 = dma.done.wait [#allocation10], 12288  }
  0x49   :  { %3485 = vsyncadd [#allocation10], 4294955008 }
  0x4a   :  { %3486 = dma.done.wait [#allocation13], 2048  }
  0x4b   :  { %3487 = vsyncadd [#allocation13], 4294965248  ;;  %v3500_v0 = vmov 0.0   ;;  %p2086_p4 = scmp.ge.s32.totalorder %s4095_s0, 8 }
  0x4c   :  { %96 = vst [vmem:[#allocation3] sm:$0xff] %v3500_v0  ;;  %v3501_v1 = vmov (!%p2086_p4), 0.0  }
  0x4d   :  { %101 = sbr.rel (%p2086_p4) target bundleno = 84 (0x54), region = 57  ;;  %102 = vst [vmem:[#allocation14] sm:$0xff] (!%p2086_p4), %v3501_v1  ;;  %103 = vst [vmem:[#allocation14 + $0x8] sm:$0xff] (!%p2086_p4), %v3501_v1 }
  0x4e   :  { %104 = vst [vmem:[#allocation14 + $0x10] sm:$0xff] (!%p2086_p4), %v3501_v1  ;;  %105 = vst [vmem:[#allocation14 + $0x18] sm:$0xff] (!%p2086_p4), %v3501_v1 }
  0x4f   :  { %106 = vst [vmem:[#allocation14 + $0x20] sm:$0xff] (!%p2086_p4), %v3501_v1  ;;  %107 = vst [vmem:[#allocation14 + $0x28] sm:$0xff] (!%p2086_p4), %v3501_v1 }
  0x50   :  { %108 = vst [vmem:[#allocation14 + $0x30] sm:$0xff] (!%p2086_p4), %v3501_v1  ;;  %109 = vst [vmem:[#allocation14 + $0x38] sm:$0xff] (!%p2086_p4), %v3501_v1 }
  0x54 PF:  { %p2088_p5 = scmp.le.s32.totalorder %s4095_s0, 0 }
  0x55   :  { %v123_v2 = vld [vmem:[#allocation9 + $0x8] sm:$0xff] (!%p2088_p5)  ;;  %v126_v3 = vld [vmem:[#allocation9 + $0x20] sm:$0xff] (!%p2088_p5)  ;;  %v125_v6 = vld [vmem:[#allocation9 + $0x18] sm:$0xff] (!%p2088_p5)  ;;  %v3502_v9 = vmov (!%p2088_p5), 0.0   ;;  %v3503_v15 = vmov (!%p2088_p5), 0   ;;  %vm3505_vm8 = vmmov (!%p2088_p5), 0  }
  0x56   :  { %113 = sbr.rel (%p2088_p5) target bundleno = 2459 (0x99b), region = 61  ;;  %v122_v4 = vld [vmem:[#allocation9] sm:$0xff] (!%p2088_p5)  ;;  %v2664_v5 = vpack.c.bf16 (!%p2088_p5), %v126_v3, %v123_v2  ;;  %v129_v7 = vld [vmem:[#allocation9 + $0x38] sm:$0xff] (!%p2088_p5)  ;;  %v132_v8 = vld [vmem:[#allocation9 + $0x50] sm:$0xff] (!%p2088_p5)  ;;  %251 = vmatprep.mubr.f32.mxu0 (!%p2088_p5), %v3502_v9  ;;  %3260 = vset.pattern.permute.xlu0 (!%p2088_p5), %v3503_v15  ;;  %p2100_p6 = scmp.le.s32.totalorder (!%p2088_p5), %s4095_s0, 1 }
  0x57   :  { %v2666_v10 = vpack.c.bf16 (!%p2088_p5), %v125_v6, %v122_v4  ;;  %v2668_v11 = vpack.c.bf16 (!%p2088_p5), %v132_v8, %v129_v7  ;;  %v128_v12 = vld [vmem:[#allocation9 + $0x30] sm:$0xff] (!%p2088_p5)  ;;  %v131_v13 = vld [vmem:[#allocation9 + $0x48] sm:$0xff] (!%p2088_p5)  ;;  %v138_v16 = vld [vmem:[#allocation9 + $0x80] sm:$0xff] (!%p2088_p5) }
  0x58   :  { %v135_v14 = vld [vmem:[#allocation9 + $0x68] sm:$0xff] (!%p2088_p5)  ;;  %2665 = vmatprep.subr.bf16.mxu0 (!%p2088_p5), %v2664_v5  ;;  %v2670_v17 = vpack.c.bf16 (!%p2088_p5), %v131_v13, %v128_v12  ;;  %v134_v19 = vld [vmem:[#allocation9 + $0x60] sm:$0xff] (!%p2088_p5)  ;;  %v137_v20 = vld [vmem:[#allocation9 + $0x78] sm:$0xff] (!%p2088_p5) }
  0x59   :  { %2667 = vmatpush1.bf16.msra.mxu0 (!%p2088_p5), %v2666_v10  ;;  %v2672_v18 = vpack.c.bf16 (!%p2088_p5), %v138_v16, %v135_v14  ;;  %v141_v21 = vld [vmem:[#allocation9 + $0x98] sm:$0xff] (!%p2088_p5)  ;;  %v144_v22 = vld [vmem:[#allocation9 + $0xb0] sm:$0xff] (!%p2088_p5)  ;;  %v2674_v23 = vpack.c.bf16 (!%p2088_p5), %v137_v20, %v134_v19  ;;  %v143_v26 = vld [vmem:[#allocation9 + $0xa8] sm:$0xff] (!%p2088_p5) }
  0x5a   :  { %2669 = vmatprep.subr.bf16.mxu0 (!%p2088_p5), %v2668_v11  ;;  %v140_v24 = vld [vmem:[#allocation9 + $0x90] sm:$0xff] (!%p2088_p5)  ;;  %v2676_v25 = vpack.c.bf16 (!%p2088_p5), %v144_v22, %v141_v21  ;;  %v127_v28 = vld [vmem:[#allocation9 + $0x28] sm:$0xff] (!%p2088_p5)  ;;  %v150_v30 = vld [vmem:[#allocation9 + $0xe0] sm:$0xff] (!%p2088_p5) }
  0x5b   :  { %v124_v27 = vld [vmem:[#allocation9 + $0x10] sm:$0xff] (!%p2088_p5)  ;;  %v147_v29 = vld [vmem:[#allocation9 + $0xc8] sm:$0xff] (!%p2088_p5)  ;;  %v130_v32 = vld [vmem:[#allocation9 + $0x40] sm:$0xff] (!%p2088_p5)  ;;  %v2678_v34 = vpack.c.bf16 (!%p2088_p5), %v143_v26, %v140_v24 }
  0x5c   :  { %v2696_v31 = vpack.c.bf16 (!%p2088_p5), %v127_v28, %v124_v27  ;;  %v133_v33 = vld [vmem:[#allocation9 + $0x58] sm:$0xff] (!%p2088_p5)  ;;  %v146_v35 = vld [vmem:[#allocation9 + $0xc0] sm:$0xff] (!%p2088_p5)  ;;  %v2680_v37 = vpack.c.bf16 (!%p2088_p5), %v150_v30, %v147_v29  ;;  %v136_v40 = vld [vmem:[#allocation9 + $0x70] sm:$0xff] (!%p2088_p5) }
  0x5d   :  { %2671 = vmatpush1.bf16.msra.mxu0 %v2670_v17  ;;  %v2700_v36 = vpack.c.bf16 %v133_v33, %v130_v32  ;;  %v149_v38 = vld [vmem:[#allocation9 + $0xd8] sm:$0xff]  ;;  %v3669_v39 = vld [vmem:[#allocation6] sm:$0xff]  ;;  %v156_v42 = vld [vmem:[#allocation9 + $0x110] sm:$0xff]  ;;  %vm3509_vm10 = vmmov (!%p2100_p6), 0  }
  0x5e   :  { %2673 = vmatprep.subr.bf16.mxu0 %v2672_v18  ;;  %2697 = vmatprep.subr.bf16.mxu1 %v2696_v31  ;;  %v153_v41 = vld [vmem:[#allocation9 + $0xf8] sm:$0xff]  ;;  %v139_v43 = vld [vmem:[#allocation9 + $0x88] sm:$0xff]  ;;  %v2682_v45 = vpack.c.bf16 %v149_v38, %v146_v35  ;;  %v142_v46 = vld [vmem:[#allocation9 + $0xa0] sm:$0xff] }
  0x5f   :  { %2699 = vmatpush3.bf16.msra.mxu1 %v2696_v31  ;;  %2337 = vmatprep.mubr.f32.mxu1 %v3669_v39  ;;  %v2704_v44 = vpack.c.bf16 %v139_v43, %v136_v40  ;;  %v145_v47 = vld [vmem:[#allocation9 + $0xb8] sm:$0xff]  ;;  %v2684_v48 = vpack.c.bf16 %v156_v42, %v153_v41  ;;  %v152_v49 = vld [vmem:[#allocation9 + $0xf0] sm:$0xff]  ;;  %v155_v50 = vld [vmem:[#allocation9 + $0x108] sm:$0xff] }
  0x60   :  { %2701 = vmatprep.subr.bf16.mxu1 %v2700_v36  ;;  %v159_v51 = vld [vmem:[#allocation9 + $0x128] sm:$0xff]  ;;  %v162_v52 = vld [vmem:[#allocation9 + $0x140] sm:$0xff]  ;;  %v2708_v53 = vpack.c.bf16 %v145_v47, %v142_v46  ;;  %v148_v54 = vld [vmem:[#allocation9 + $0xd0] sm:$0xff]  ;;  %v2686_v56 = vpack.c.bf16 %v155_v50, %v152_v49  ;;  %v3504_v46 = vmov 0.0|0.0  }
  0x61   :  { %2675 = vmatpush1.bf16.msra.mxu0 %v2674_v23  ;;  %v151_v55 = vld [vmem:[#allocation9 + $0xe8] sm:$0xff]  ;;  %v2688_v57 = vpack.c.bf16 %v162_v52, %v159_v51  ;;  %v158_v58 = vld [vmem:[#allocation9 + $0x120] sm:$0xff]  ;;  %v161_v59 = vld [vmem:[#allocation9 + $0x138] sm:$0xff] }
  0x62   :  { %2677 = vmatprep.subr.bf16.mxu0 %v2676_v25  ;;  %v165_v60 = vld [vmem:[#allocation9 + $0x158] sm:$0xff]  ;;  %v168_v61 = vld [vmem:[#allocation9 + $0x170] sm:$0xff]  ;;  %v2712_v62 = vpack.c.bf16 %v151_v55, %v148_v54  ;;  %v154_v63 = vld [vmem:[#allocation9 + $0x100] sm:$0xff]  ;;  %v2690_v2 = vpack.c.bf16 %v161_v59, %v158_v58 }
  0x63   :  { %2703 = vmatpush3.bf16.msra.mxu1 %v2700_v36  ;;  %v157_v1 = vld [vmem:[#allocation9 + $0x118] sm:$0xff]  ;;  %v2692_v3 = vpack.c.bf16 %v168_v61, %v165_v60  ;;  %v164_v4 = vld [vmem:[#allocation9 + $0x150] sm:$0xff]  ;;  %v167_v5 = vld [vmem:[#allocation9 + $0x168] sm:$0xff] }
  0x64   :  { %2705 = vmatprep.subr.bf16.mxu1 %v2704_v44  ;;  %v447_v6 = vld [vmem:[#allocation11 + $0x8] sm:$0xff]  ;;  %v450_v7 = vld [vmem:[#allocation11 + $0x20] sm:$0xff]  ;;  %v2716_v8 = vpack.c.bf16 %v157_v1, %v154_v63  ;;  %v160_v10 = vld [vmem:[#allocation9 + $0x130] sm:$0xff]  ;;  %v2694_v12 = vpack.c.bf16 %v167_v5, %v164_v4 }
  0x65   :  { %2679 = vmatpush1.bf16.msra.mxu0 %v2678_v34  ;;  %v163_v11 = vld [vmem:[#allocation9 + $0x148] sm:$0xff]  ;;  %v3672_v13 = vpack.c.bf16 %v450_v7, %v447_v6  ;;  %v446_v14 = vld [vmem:[#allocation11] sm:$0xff]  ;;  %v449_v16 = vld [vmem:[#allocation11 + $0x18] sm:$0xff] }
  0x66   :  { %2681 = vmatprep.subr.bf16.mxu0 %v2680_v37  ;;  %v453_v17 = vld [vmem:[#allocation11 + $0x38] sm:$0xff]  ;;  %v456_v18 = vld [vmem:[#allocation11 + $0x50] sm:$0xff]  ;;  %v2720_v19 = vpack.c.bf16 %v163_v11, %v160_v10  ;;  %v166_v21 = vld [vmem:[#allocation9 + $0x160] sm:$0xff]  ;;  %v3674_v23 = vpack.c.bf16 %v449_v16, %v446_v14 }
  0x67   :  { %2707 = vmatpush3.bf16.msra.mxu1 %v2704_v44  ;;  %v452_v20 = vld [vmem:[#allocation11 + $0x30] sm:$0xff]  ;;  %v169_v22 = vld [vmem:[#allocation9 + $0x178] sm:$0xff]  ;;  %v455_v24 = vld [vmem:[#allocation11 + $0x48] sm:$0xff]  ;;  %v3677_v27 = vpack.c.bf16 %v456_v18, %v453_v17 }
  0x68   :  { %2709 = vmatprep.subr.bf16.mxu1 %v2708_v53  ;;  %v459_v25 = vld [vmem:[#allocation11 + $0x68] sm:$0xff]  ;;  %v462_v26 = vld [vmem:[#allocation11 + $0x80] sm:$0xff]  ;;  %v2724_v28 = vpack.c.bf16 %v169_v22, %v166_v21  ;;  %v3680_v29 = vpack.c.bf16 %v455_v24, %v452_v20  ;;  %v3687_v31 = vld [vmem:[%s4096_s1] sm:$0xff] }
  0x69   :  { %2683 = vmatpush1.bf16.msra.mxu0 %v2682_v45  ;;  %v3682_v30 = vpack.c.bf16 %v462_v26, %v459_v25  ;;  %v115_v32 = vld [vmem:[#allocation6 + $0x8] sm:$0xff]  ;;  %vm2089_vm0 = vcmp.gt.s32.totalorder %v3687_v31, 0  ;;  %vm2090_vm1 = vcmp.gt.s32.totalorder %v3687_v31, 1  ;;  %vm2091_vm2 = vcmp.gt.s32.totalorder %v3687_v31, 2  ;;  %v458_v33 = vld [vmem:[#allocation11 + $0x60] sm:$0xff]  ;;  %v461_v34 = vld [vmem:[#allocation11 + $0x78] sm:$0xff] }
  0x6a   :  { %2685 = vmatprep.subr.bf16.mxu0 %v2684_v48  ;;  %vm2092_vm3 = vcmp.gt.s32.totalorder %v3687_v31, 3  ;;  %vm2093_vm4 = vcmp.gt.s32.totalorder %v3687_v31, 4  ;;  %vm2094_vm5 = vcmp.gt.s32.totalorder %v3687_v31, 5  ;;  %vm2095_vm6 = vcmp.gt.s32.totalorder %v3687_v31, 6  ;;  %v465_v35 = vld [vmem:[#allocation11 + $0x98] sm:$0xff]  ;;  %v468_v36 = vld [vmem:[#allocation11 + $0xb0] sm:$0xff] }
  0x6b   :  { %2711 = vmatpush3.bf16.msra.mxu1 %v2708_v53  ;;  %vm2096_vm7 = vcmp.gt.s32.totalorder %v3687_v31, 7  ;;  %v677_v37 = vsel %vm2089_vm0, 1, %v3503_v15  ;;  %v448_v38 = vld [vmem:[#allocation11 + $0x10] sm:$0xff]  ;;  %v3703_v41 = vpack.c.bf16 %v461_v34, %v458_v33  ;;  %v3706_v42 = vpack.c.bf16 %v468_v36, %v465_v35  ;;  %v467_v44 = vld [vmem:[#allocation11 + $0xa8] sm:$0xff]  ;;  %v474_v15 = vld [vmem:[#allocation11 + $0xe0] sm:$0xff] }
  0x6c   :  { %2713 = vmatprep.subr.bf16.mxu1 %v2712_v62  ;;  %679 = vperm.xlu0 %3260, %v677_v37   ;;  %v116_v40 = vld [vmem:[#allocation6 + $0x10] sm:$0xff]  ;;  %v471_v45 = vld [vmem:[#allocation11 + $0xc8] sm:$0xff]  ;;  %v454_v48 = vld [vmem:[#allocation11 + $0x40] sm:$0xff] }
  0x6d   :  { %2687 = vmatpush1.bf16.msra.mxu0 %v2686_v56  ;;  %v464_v43 = vld [vmem:[#allocation11 + $0x90] sm:$0xff]  ;;  %v457_v49 = vld [vmem:[#allocation11 + $0x58] sm:$0xff]  ;;  %v3716_v52 = vpack.c.bf16 %v474_v15, %v471_v45  ;;  %v470_v53 = vld [vmem:[#allocation11 + $0xc0] sm:$0xff] }
  0x6e   :  { %2689 = vmatprep.subr.bf16.mxu0 %v2688_v57  ;;  %v117_v50 = vld [vmem:[#allocation6 + $0x18] sm:$0xff]  ;;  %v3713_v51 = vpack.c.bf16 %v467_v44, %v464_v43  ;;  %v480_v56 = vld [vmem:[#allocation11 + $0x110] sm:$0xff]  ;;  %v3719_v57 = vpack.c.bf16 %v457_v49, %v454_v48  ;;  %v463_v59 = vld [vmem:[#allocation11 + $0x88] sm:$0xff] }
  0x6f   :  { %2715 = vmatpush3.bf16.msra.mxu1 %v2712_v62  ;;  %v473_v54 = vld [vmem:[#allocation11 + $0xd8] sm:$0xff]  ;;  %v460_v58 = vld [vmem:[#allocation11 + $0x70] sm:$0xff]  ;;  %v118_v60 = vld [vmem:[#allocation6 + $0x20] sm:$0xff] }
  0x70   :  { %2717 = vmatprep.subr.bf16.mxu1 %v2716_v8  ;;  %v477_v55 = vld [vmem:[#allocation11 + $0xf8] sm:$0xff]  ;;  %v3724_v61 = vpack.c.bf16 %v473_v54, %v470_v53  ;;  %v476_v63 = vld [vmem:[#allocation11 + $0xf0] sm:$0xff]  ;;  %v479_v1 = vld [vmem:[#allocation11 + $0x108] sm:$0xff]  ;;  %v3730_v4 = vpack.c.bf16 %v463_v59, %v460_v58 }
  0x71   :  { %2691 = vmatpush1.bf16.msra.mxu0 %v2690_v2  ;;  %v3727_v62 = vpack.c.bf16 %v480_v56, %v477_v55  ;;  %v483_v2 = vld [vmem:[#allocation11 + $0x128] sm:$0xff]  ;;  %v466_v5 = vld [vmem:[#allocation11 + $0xa0] sm:$0xff]  ;;  %v469_v6 = vld [vmem:[#allocation11 + $0xb8] sm:$0xff] }
  0x72   :  { %2693 = vmatprep.subr.bf16.mxu0 %v2692_v3  ;;  %v486_v3 = vld [vmem:[#allocation11 + $0x140] sm:$0xff]  ;;  %v119_v7 = vld [vmem:[#allocation6 + $0x28] sm:$0xff]  ;;  %v120_v10 = vld [vmem:[#allocation6 + $0x30] sm:$0xff]  ;;  %v3741_v18 = vpack.c.bf16 %v469_v6, %v466_v5 }
  0x73   :  { %2719 = vmatpush3.bf16.msra.mxu1 %v2716_v8  ;;  %v3735_v8 = vpack.c.bf16 %v479_v1, %v476_v63  ;;  %v3738_v11 = vpack.c.bf16 %v486_v3, %v483_v2  ;;  %v485_v14 = vld [vmem:[#allocation11 + $0x138] sm:$0xff]  ;;  %v492_v17 = vld [vmem:[#allocation11 + $0x170] sm:$0xff]  ;;  %v475_v20 = vld [vmem:[#allocation11 + $0xe8] sm:$0xff] }
  0x74   :  { %2721 = vmatprep.subr.bf16.mxu1 %v2720_v19  ;;  %v489_v16 = vld [vmem:[#allocation11 + $0x158] sm:$0xff]  ;;  %v488_v25 = vld [vmem:[#allocation11 + $0x150] sm:$0xff]  ;;  %v491_v26 = vld [vmem:[#allocation11 + $0x168] sm:$0xff] }
  0x75   :  { %2695 = vmatpush1.bf16.msra.mxu0 %v2694_v12  ;;  %v482_v12 = vld [vmem:[#allocation11 + $0x120] sm:$0xff]  ;;  %v121_v22 = vld [vmem:[#allocation6 + $0x38] sm:$0xff]  ;;  %v3749_v24 = vpack.c.bf16 %v492_v17, %v489_v16  ;;  %v3758_v34 = vpack.c.bf16 %v491_v26, %v488_v25  ;;  %v484_v36 = vld [vmem:[#allocation11 + $0x130] sm:$0xff] }
  0x76   :  { %2729 = vmatprep.subr.bf16.mxu0 %v3672_v13  ;;  %v3746_v21 = vpack.c.bf16 %v485_v14, %v482_v12  ;;  %v481_v33 = vld [vmem:[#allocation11 + $0x118] sm:$0xff]  ;;  %v487_v37 = vld [vmem:[#allocation11 + $0x148] sm:$0xff] }
  0x77   :  { %2723 = vmatpush3.bf16.msra.mxu1 %v2720_v19  ;;  %v472_v19 = vld [vmem:[#allocation11 + $0xd0] sm:$0xff]  ;;  %v493_v43 = vld [vmem:[#allocation11 + $0x178] sm:$0xff] }
  0x78   :  { %252 = vmatmul.mubr.f32.vlgmr.msra.gmra.mrb[0].mxu0 %v3669_v39  ;;  %2725 = vmatprep.subr.bf16.mxu1 %v2724_v28  ;;  %v451_v39 = vld [vmem:[#allocation11 + $0x28] sm:$0xff]  ;;  %v170_v48 = vld [vmem:[%s4099_s4] sm:$0x7] }
  0x79   :  { %2731 = vmatpush1.bf16.msra.mxu0 %v3674_v23  ;;  %257 = vmatprep.mubr.f32.mxu0 %v3502_v9  ;;  %v3709_v47 = vpack.c.bf16 %v451_v39, %v448_v38  ;;  %v3767_v38 = vld [vmem:[#allocation3] sm:$0xff]  ;;  %v3770_v39 = vpack.c.bf16 %v487_v37, %v484_v36 }
  0x7a   :  { %2733 = vmatprep.subr.bf16.mxu0 %v3677_v27 }
  0x7b   :  { %2727 = vmatpush3.bf16.msra.mxu1 %v2724_v28  ;;  %v3752_v28 = vpack.c.bf16 %v475_v20, %v472_v19 }
  0x7c   :  { %258 = vmatmul.mubr.f32.gmra.mrb[2].mxu0 %v115_v32  ;;  %2760 = vmatprep.subr.bf16.mxu1 %v3504_v46 }
  0x7d   :  { %2735 = vmatpush1.bf16.msra.mxu0 %v3680_v29  ;;  %263 = vmatprep.mubr.f32.mxu0 %v3502_v9 }
  0x7e   :  { %2737 = vmatprep.subr.bf16.mxu0 %v3682_v30  ;;  %2338 = vmatmul.mubr.f32.vlgmr.msra.gmra.mrb[0].mxu1 %v115_v32  ;;  %v478_v32 = vld [vmem:[#allocation11 + $0x100] sm:$0xff] }
  0x7f   :  { %2762 = vmatpush3.bf16.msra.mxu1 %v3709_v47  ;;  %2340 = vmatprep.mubr.f32.mxu1 %v116_v40  ;;  %v3762_v35 = vpack.c.bf16 %v481_v33, %v478_v32 }
  0x80   :  { %264 = vmatmul.mubr.f32.gmra.mrb[4].mxu0 %v116_v40  ;;  %2763 = vmatprep.subr.bf16.mxu1 %v3504_v46  ;;  %v490_v40 = vld [vmem:[#allocation11 + $0x160] sm:$0xff] }
  0x81   :  { %2739 = vmatpush1.bf16.msra.mxu0 %v3703_v41  ;;  %269 = vmatprep.mubr.f32.mxu0 %v3502_v9  ;;  %v3775_v44 = vpack.c.bf16 %v493_v43, %v490_v40 }
  0x82   :  { %2741 = vmatprep.subr.bf16.mxu0 %v3706_v42  ;;  %2341 = vmatmul.mubr.f32.gmra.mrb[2].mxu1 %v117_v50 }
  0x83   :  { %2765 = vmatpush3.bf16.msra.mxu1 %v3719_v57  ;;  %2343 = vmatprep.mubr.f32.mxu1 %v118_v60 }
  0x84   :  { %270 = vmatmul.mubr.f32.gmra.mrb[6].mxu0 %v117_v50  ;;  %2766 = vmatprep.subr.bf16.mxu1 %v3504_v46  ;;  %v3790_v50 = vld [vmem:[%s4101_s6] sm:$0x7] }
  0x85   :  { %2743 = vmatpush1.bf16.msra.mxu0 %v3713_v51  ;;  %275 = vmatprep.mubr.f32.mxu0 %v3502_v9 }
  0x86   :  { %2745 = vmatprep.subr.bf16.mxu0 %v3716_v52  ;;  %2344 = vmatmul.mubr.f32.gmra.mrb[4].mxu1 %v119_v7 }
  0x87   :  { %2768 = vmatpush3.bf16.msra.mxu1 %v3730_v4  ;;  %2346 = vmatprep.mubr.f32.mxu1 %v120_v10 }
  0x88   :  { %276 = vmatmul.mubr.f32.gmra.mrb[8].mxu0 %v118_v60  ;;  %2769 = vmatprep.subr.bf16.mxu1 %v3504_v46 }
  0x89   :  { %2747 = vmatpush1.bf16.msra.mxu0 %v3724_v61  ;;  %281 = vmatprep.mubr.f32.mxu0 %v3502_v9 }
  0x8a   :  { %2749 = vmatprep.subr.bf16.mxu0 %v3727_v62  ;;  %2347 = vmatmul.mubr.f32.gmra.mrb[6].mxu1 %v121_v22 }
  0x8b   :  { %2771 = vmatpush3.bf16.msra.mxu1 %v3741_v18  ;;  %2381 = vmatprep.mubr.msk.f32.mxu1 %vm3505_vm8, %v3502_v9 }
  0x8c   :  { %282 = vmatmul.mubr.f32.gmra.mrb[10].mxu0 %v119_v7  ;;  %2772 = vmatprep.subr.bf16.mxu1 %v3504_v46 }
  0x8d   :  { %2751 = vmatpush1.bf16.msra.mxu0 %v3735_v8  ;;  %287 = vmatprep.mubr.f32.mxu0 %v3502_v9 }
  0x8e   :  { %2753 = vmatprep.subr.bf16.mxu0 %v3738_v11 }
  0x8f   :  { %2774 = vmatpush3.bf16.msra.mxu1 %v3752_v28 }
  0x90   :  { %288 = vmatmul.mubr.f32.gmra.mrb[12].mxu0 %v120_v10  ;;  %2775 = vmatprep.subr.bf16.mxu1 %v3504_v46 }
  0x91   :  { %2755 = vmatpush1.bf16.msra.mxu0 %v3746_v21  ;;  %293 = vmatprep.mubr.f32.mxu0 %v3502_v9 }
  0x92   :  { %2757 = vmatprep.subr.bf16.mxu0 %v3749_v24 }
  0x93   :  { %2777 = vmatpush3.bf16.msra.mxu1 %v3762_v35 }
  0x94   :  { %294 = vmatmul.mubr.f32.gmra.mrb[14].mxu0 %v121_v22  ;;  %2778 = vmatprep.subr.bf16.mxu1 %v3504_v46 }
  0x95   :  { %2759 = vmatpush1.bf16.msra.mxu0 %v3758_v34  ;;  %579 = vmatprep.mubr.f32.mxu0 %v3502_v9  ;;  %v172_v9 = vlaneseq }
  0x96   :  { %2785 = vmatprep.subr.bf16.mxu0 (!%p2100_p6), %v3672_v13 }
  0x97   :  { %2780 = vmatpush3.bf16.msra.mxu1 %v3770_v39  ;;  %v3780_v45 = vshrl.u32 %v172_v9, 7 }
  0x98   :  { %580 = vmatmul.mubr.f32.vlgmr.msra.gmra.mrb[0].mxu0 %v3767_v38  ;;  %2781 = vmatprep.subr.bf16.mxu1 %v3504_v46 }
  0x99   :  { %v174_v15 = vsub.s32 0, %v3780_v45  ;;  %v178_v49 = vsub.s32 1, %v3780_v45  ;;  %v182_v59 = vsub.s32 2, %v3780_v45  ;;  %2787 = vmatpush1.bf16.msra.mxu0 (!%p2100_p6), %v3674_v23 }
  0x9a   :  { %2789 = vmatprep.subr.bf16.mxu0 (!%p2100_p6), %v3677_v27 }
  0x9b   :  { %2783 = vmatpush3.bf16.msra.mxu1 %v3775_v44  ;;  %v3792_v46 = vrot.slane %v170_v48, %v174_v15  ;;  %v3795_v53 = vrot.slane %v3790_v50, %v174_v15  ;;  %v3797_v54 = vrot.slane %v170_v48, %v178_v49  ;;  %v3800_v55 = vrot.slane %v3790_v50, %v178_v49 }
  0x9c   :  { %v183_v3 = vrot.slane %v170_v48, %v182_v59 }
  0x9d   :  { %v3804_v56 = vadd.f32 %v3795_v53, %v3792_v46  ;;  %v3808_v58 = vadd.f32 %v3800_v55, %v3797_v54  ;;  %2791 = vmatpush1.bf16.msra.mxu0 (!%p2100_p6), %v3680_v29 }
  0x9e   :  { %2382 = vmatmul.mubr.f32.vlgmr.msra.gmra.mrb[8].mxu1 %v3767_v38  ;;  %2793 = vmatprep.subr.bf16.mxu0 (!%p2100_p6), %v3682_v30 }
  0xa1   :  { %2795 = vmatpush1.bf16.msra.mxu0 (!%p2100_p6), %v3703_v41 }
  0xa2   :  { %2797 = vmatprep.subr.bf16.mxu0 (!%p2100_p6), %v3706_v42 }
  0xa5   :  { %2799 = vmatpush1.bf16.msra.mxu0 (!%p2100_p6), %v3713_v51 }
  0xa6   :  { %2801 = vmatprep.subr.bf16.mxu0 (!%p2100_p6), %v3716_v52 }
  0xa9   :  { %2803 = vmatpush1.bf16.msra.mxu0 (!%p2100_p6), %v3724_v61 }
  0xaa   :  { %2805 = vmatprep.subr.bf16.mxu0 (!%p2100_p6), %v3727_v62 }
  0xad   :  { %2807 = vmatpush1.bf16.msra.mxu0 (!%p2100_p6), %v3735_v8 }
  0xae   :  { %2809 = vmatprep.subr.bf16.mxu0 (!%p2100_p6), %v3738_v11 }
  0xb1   :  { %2811 = vmatpush1.bf16.msra.mxu0 (!%p2100_p6), %v3746_v21 }
  0xb2   :  { %2813 = vmatprep.subr.bf16.mxu0 (!%p2100_p6), %v3749_v24 }
  0xb5   :  { %2815 = vmatpush1.bf16.msra.mxu0 (!%p2100_p6), %v3758_v34 }
 0x14f   :  { %v259_v60 = vpop.f32.mrb[2].mxu0 }
 0x150   :  { %v260_v63 = vadd.f32 %v259_v60, %v3792_v46  ;;  %v261_v1 = vpop.f32.mrb[3].mxu0 }
 0x151   :  { %v262_v2 = vadd.f32 %v261_v1, %v3797_v54  ;;  %v2339_v12 = vpop.f32.mrb[0].mxu1 }
 0x152   :  { %408 = vst [vmem:[#allocation2 + $0x18] sm:$0xff] %v260_v63  ;;  %v372_v14 = vadd.f32 %v2339_v12, %v183_v3  ;;  %v366_v16 = vpop.f32.mrb[1].mxu1 }
 0x153   :  { %409 = vst [vmem:[#allocation2 + $0x20] sm:$0xff] %v262_v2  ;;  %v265_v5 = vpop.f32.mrb[4].mxu0  ;;  %v3817_v19 = vadd.f32 %v366_v16, %v183_v3 }
 0x154   :  { %v266_v6 = vadd.f32 %v265_v5, %v3792_v46  ;;  %v267_v7 = vpop.f32.mrb[5].mxu0  ;;  %410 = vst [vmem:[#allocation2 + $0x28] sm:$0xff] %v372_v14 }
 0x155   :  { %v268_v10 = vadd.f32 %v267_v7, %v3797_v54  ;;  %v2342_v26 = vpop.f32.mrb[2].mxu1 }
 0x156   :  { %411 = vst [vmem:[#allocation2 + $0x30] sm:$0xff] %v266_v6  ;;  %v382_v32 = vadd.f32 %v2342_v26, %v183_v3  ;;  %v376_v33 = vpop.f32.mrb[3].mxu1 }
 0x157   :  { %412 = vst [vmem:[#allocation2 + $0x38] sm:$0xff] %v268_v10  ;;  %v271_v17 = vpop.f32.mrb[6].mxu0  ;;  %v377_v37 = vadd.f32 %v376_v33, %v183_v3 }
 0x158   :  { %v272_v20 = vadd.f32 %v271_v17, %v3792_v46  ;;  %v273_v22 = vpop.f32.mrb[7].mxu0  ;;  %416 = vst [vmem:[#allocation2 + $0x58] sm:$0xff] %v382_v32 }
 0x159   :  { %v274_v25 = vadd.f32 %v273_v22, %v3797_v54  ;;  %413 = vst [vmem:[#allocation2 + $0x40] sm:$0xff] %v377_v37  ;;  %v2345_v15 = vpop.f32.mrb[4].mxu1 }
 0x15a   :  { %414 = vst [vmem:[#allocation2 + $0x48] sm:$0xff] %v272_v20  ;;  %v392_v48 = vadd.f32 %v2345_v15, %v183_v3  ;;  %v386_v49 = vpop.f32.mrb[5].mxu1 }
 0x15b   :  { %415 = vst [vmem:[#allocation2 + $0x50] sm:$0xff] %v274_v25  ;;  %v277_v36 = vpop.f32.mrb[8].mxu0  ;;  %v387_v63 = vadd.f32 %v386_v49, %v183_v3 }
 0x15c   :  { %v278_v40 = vadd.f32 %v277_v36, %v3792_v46  ;;  %v279_v43 = vpop.f32.mrb[9].mxu0  ;;  %422 = vst [vmem:[#allocation2 + $0x88] sm:$0xff] %v392_v48 }
 0x15d   :  { %v280_v9 = vadd.f32 %v279_v43, %v3797_v54  ;;  %419 = vst [vmem:[#allocation2 + $0x70] sm:$0xff] %v387_v63  ;;  %v2348_v6 = vpop.f32.mrb[6].mxu1  ;;  %v3834_v43 = vrot.slane %v3790_v50, %v182_v59  ;;  %v680_v50 = vpop.permute.xlu0 %679 }
 0x15e   :  { %417 = vst [vmem:[#allocation2 + $0x60] sm:$0xff] %v278_v40  ;;  %v402_v7 = vadd.f32 %v2348_v6, %v183_v3  ;;  %v396_v10 = vpop.f32.mrb[7].mxu1  ;;  %vm681_vm9 = vcmp.eq.s32.totalorder %v680_v50, 1 }
 0x15f   :  { %418 = vst [vmem:[#allocation2 + $0x68] sm:$0xff] %v280_v9  ;;  %v283_v60 = vpop.f32.mrb[10].mxu0  ;;  %v397_v14 = vadd.f32 %v396_v10, %v183_v3 }
 0x160   :  { %v284_v1 = vadd.f32 %v283_v60, %v3792_v46  ;;  %v285_v2 = vpop.f32.mrb[11].mxu0  ;;  %428 = vst [vmem:[#allocation2 + $0xb8] sm:$0xff] %v402_v7 }
 0x161   :  { %v286_v5 = vadd.f32 %v285_v2, %v3797_v54  ;;  %425 = vst [vmem:[#allocation2 + $0xa0] sm:$0xff] %v397_v14  ;;  %v3507_v14 = vmov (!%p2100_p6), 0  }
 0x162   :  { %420 = vst [vmem:[#allocation2 + $0x78] sm:$0xff] %v284_v1  ;;  %3271 = vset.pattern.permute.xlu0 (!%p2100_p6), %v3507_v14 }
 0x163   :  { %421 = vst [vmem:[#allocation2 + $0x80] sm:$0xff] %v286_v5  ;;  %v289_v12 = vpop.f32.mrb[12].mxu0 }
 0x164   :  { %v290_v16 = vadd.f32 %v289_v12, %v3792_v46  ;;  %v291_v17 = vpop.f32.mrb[13].mxu0 }
 0x165   :  { %v292_v20 = vadd.f32 %v291_v17, %v3797_v54 }
 0x166   :  { %423 = vst [vmem:[#allocation2 + $0x90] sm:$0xff] %v290_v16  ;;  %v3508_v16 = vmov (!%p2100_p6), 0.0  }
 0x167   :  { %424 = vst [vmem:[#allocation2 + $0x98] sm:$0xff] %v292_v20  ;;  %v295_v22 = vpop.f32.mrb[14].mxu0  ;;  %759 = vmatprep.mubr.f32.mxu0 (!%p2100_p6), %v3508_v16  ;;  %2416 = vmatprep.mubr.msk.f32.mxu1 (!%p2100_p6), %vm3509_vm10, %v3508_v16  ;;  %v691_v20 = vld [vmem:[#allocation2 + $0x18] sm:$0xff] (!%p2100_p6) }
 0x168   :  { %v296_v25 = vadd.f32 %v295_v22, %v3792_v46  ;;  %v297_v26 = vpop.f32.mrb[15].mxu0 }
 0x169   :  { %v298_v32 = vadd.f32 %v297_v26, %v3797_v54 }
 0x16a   :  { %426 = vst [vmem:[#allocation2 + $0xa8] sm:$0xff] %v296_v25 }
 0x16b   :  { %427 = vst [vmem:[#allocation2 + $0xb0] sm:$0xff] %v298_v32  ;;  %v581_v33 = vpop.f32.mrb[0].mxu0 }
 0x16c   :  { %v3205_v3 = vadd.f32 %v3804_v56, %v581_v33  ;;  %v583_v36 = vpop.f32.mrb[1].mxu0 }
 0x16d   :  { %v3211_v40 = vadd.f32 %v3808_v58, %v583_v36 }
 0x16e   :  { %v2097_v37 = vmul.f32 -1.442695, %v3205_v3 }
 0x16f   :  { %v2098_v9 = vmul.f32 -1.442695, %v3211_v40 }
 0x170   :  { %3261 = vpow2.f32 %v2097_v37  ;;  %v692_v37 = vld [vmem:[#allocation2 + $0x20] sm:$0xff] (!%p2100_p6) }
 0x171   :  { %v652_v46 = vpop.f32.mrb[8].mxu1  ;;  %3263 = vpow2.f32 %v2098_v9 }
 0x172   :  { %v653_v15 = vadd.f32 %v652_v46, %v3834_v43  ;;  %v2383_v54 = vpop.f32.mrb[9].mxu1 }
 0x17a   :  { %v3262_v48 = vpop.eup %3261 }
 0x17b   :  { %v664_v49 = vadd.f32 1.0, %v3262_v48  ;;  %v3264_v56 = vpop.eup %3263 }
 0x17c   :  { %v665_v60 = vadd.f32 1.0, %v3264_v56 }
 0x17d   :  { %3265 = vrcp.f32 %v664_v49 }
 0x17e   :  { %3267 = vrcp.f32 %v665_v60 }
 0x187   :  { %v3266_v63 = vpop.eup %3265 }
 0x188   :  { %v670_v58 = vmul.f32 %v3266_v63, %v653_v15  ;;  %v3268_v45 = vpop.eup %3267  ;;  %v693_v63 = vld [vmem:[#allocation2 + $0x28] sm:$0xff] (!%p2100_p6) }
 0x189   :  { %v673_v59 = vsub.f32 1.0, %v3268_v45  ;;  %v675_v6 = vmul.f32 %v3268_v45, %v3767_v38 }
 0x18a   :  { %v671_v1 = vadd.f32 %v670_v58, %v3817_v19  ;;  %v3506_v19 = vmov (!%p2100_p6), 0.0|0.0  }
 0x18b   :  { %2816 = vmatprep.subr.bf16.mxu1 (!%p2100_p6), %v3506_v19 }
 0x18c   :  { %3269 = vtanh.f32 %v671_v1  ;;  %2818 = vmatpush3.bf16.msra.mxu1 (!%p2100_p6), %v3709_v47 }
 0x18d   :  { %2819 = vmatprep.subr.bf16.mxu1 (!%p2100_p6), %v3506_v19 }
 0x190   :  { %2821 = vmatpush3.bf16.msra.mxu1 (!%p2100_p6), %v3719_v57 }
 0x191   :  { %2822 = vmatprep.subr.bf16.mxu1 (!%p2100_p6), %v3506_v19 }
 0x194   :  { %2824 = vmatpush3.bf16.msra.mxu1 (!%p2100_p6), %v3730_v4 }
 0x195   :  { %2825 = vmatprep.subr.bf16.mxu1 (!%p2100_p6), %v3506_v19 }
 0x196   :  { %v3270_v2 = vpop.eup %3269  ;;  %690 = sbr.rel (%p2100_p6) target bundleno = 683 (0x2ab), region = 65 }
 0x197   :  { %v674_v5 = vmul.f32 %v3270_v2, %v673_v59 }
 0x198   :  { %2827 = vmatpush3.bf16.msra.mxu1 (!%p2100_p6), %v3741_v18 }
 0x199   :  { %v676_v7 = vadd.f32 %v675_v6, %v674_v5  ;;  %2828 = vmatprep.subr.bf16.mxu1 (!%p2100_p6), %v3506_v19 }
 0x19b   :  { %v682_v10 = vsel %vm681_vm9, %v676_v7, %v3767_v38  ;;  %v684_v12 = vsel %vm681_vm9, %v676_v7, 0.0  ;;  %v857_v38 = vsel (!%p2100_p6), %vm2090_vm1, 1, %v3507_v14 }
 0x19c   :  { %683 = vst [vmem:[#allocation3] sm:$0xff] %v682_v10  ;;  %685 = vst [vmem:[#allocation14] sm:$0xff] %v684_v12  ;;  %859 = vperm.xlu0 (!%p2100_p6), %3271, %v857_v38   ;;  %2830 = vmatpush3.bf16.msra.mxu1 (!%p2100_p6), %v3752_v28 }
 0x19d   :  { %2831 = vmatprep.subr.bf16.mxu1 %v3506_v19 }
 0x1a0   :  { %2833 = vmatpush3.bf16.msra.mxu1 %v3762_v35 }
 0x1a1   :  { %2834 = vmatprep.subr.bf16.mxu1 %v3506_v19 }
 0x1a3   :  { %v694_v17 = vld [vmem:[#allocation3] sm:$0xff] }
 0x1a4   :  { %2836 = vmatpush3.bf16.msra.mxu1 %v3770_v39  ;;  %760 = vmatmul.mubr.f32.vlgmr.msra.gmra.mrb[0].mxu0 %v694_v17 }
 0x1a5   :  { %2837 = vmatprep.subr.bf16.mxu1 %v3506_v19 }
 0x1a8   :  { %2839 = vmatpush3.bf16.msra.mxu1 %v3775_v44 }
 0x1ab   :  { %2417 = vmatmul.mubr.f32.vlgmr.msra.gmra.mrb[0].mxu1 %v694_v17 }
 0x21b   :  { %v860_v50 = vpop.permute.xlu0 %859 }
 0x21c   :  { %vm861_vm11 = vcmp.eq.s32.totalorder %v860_v50, 1 }
 0x277   :  { %v761_v22 = vpop.f32.mrb[0].mxu0 }
 0x278   :  { %v762_v25 = vadd.f32 %v761_v22, %v3795_v53  ;;  %v763_v26 = vpop.f32.mrb[1].mxu0 }
 0x279   :  { %v764_v33 = vadd.f32 %v763_v26, %v3800_v55 }
 0x27a   :  { %v836_v36 = vadd.f32 %v762_v25, %v691_v20 }
 0x27b   :  { %v837_v9 = vadd.f32 %v764_v33, %v692_v37 }
 0x27c   :  { %v2101_v40 = vmul.f32 -1.442695, %v836_v36 }
 0x27d   :  { %v2102_v46 = vmul.f32 -1.442695, %v837_v9 }
 0x27e   :  { %v832_v32 = vpop.f32.mrb[0].mxu1  ;;  %3272 = vpow2.f32 %v2101_v40 }
 0x27f   :  { %v2418_v3 = vpop.f32.mrb[1].mxu1  ;;  %3274 = vpow2.f32 %v2102_v46  ;;  %v833_v56 = vadd.f32 %v832_v32, %v3834_v43 }
 0x288   :  { %v3273_v15 = vpop.eup %3272 }
 0x289   :  { %v844_v54 = vadd.f32 1.0, %v3273_v15  ;;  %v3275_v48 = vpop.eup %3274 }
 0x28a   :  { %v845_v49 = vadd.f32 1.0, %v3275_v48 }
 0x28b   :  { %3276 = vrcp.f32 %v844_v54 }
 0x28c   :  { %3278 = vrcp.f32 %v845_v49 }
 0x295   :  { %v3277_v60 = vpop.eup %3276 }
 0x296   :  { %v850_v58 = vmul.f32 %v3277_v60, %v833_v56  ;;  %v3279_v45 = vpop.eup %3278 }
 0x297   :  { %v853_v59 = vsub.f32 1.0, %v3279_v45  ;;  %v855_v6 = vmul.f32 %v3279_v45, %v694_v17 }
 0x298   :  { %v851_v1 = vadd.f32 %v850_v58, %v693_v63 }
 0x29a   :  { %3280 = vtanh.f32 %v851_v1 }
 0x2a4   :  { %v3281_v2 = vpop.eup %3280 }
 0x2a5   :  { %v854_v5 = vmul.f32 %v3281_v2, %v853_v59 }
 0x2a7   :  { %v856_v7 = vadd.f32 %v855_v6, %v854_v5 }
 0x2a9   :  { %v862_v10 = vsel %vm861_vm11, %v856_v7, %v694_v17  ;;  %v864_v12 = vsel %vm861_vm11, %v856_v7, 0.0 }
 0x2aa   :  { %863 = vst [vmem:[#allocation3] sm:$0xff] %v862_v10  ;;  %866 = vst [vmem:[#allocation14 + $0x8] sm:$0xff] %v864_v12 }
 0x2ab PF:  { %p2104_p7 = scmp.le.s32.totalorder %s4095_s0, 2 }
 0x2ac   :  { %2841 = vmatprep.subr.bf16.mxu0 (!%p2104_p7), %v3672_v13  ;;  %v3510_v19 = vmov (!%p2104_p7), 0.0|0.0   ;;  %v3511_v14 = vmov (!%p2104_p7), 0   ;;  %v3512_v16 = vmov (!%p2104_p7), 0.0   ;;  %vm3513_vm12 = vmmov (!%p2104_p7), 0   ;;  %v872_v20 = vld [vmem:[#allocation2 + $0x30] sm:$0xff] (!%p2104_p7)  ;;  %v873_v37 = vld [vmem:[#allocation2 + $0x38] sm:$0xff] (!%p2104_p7) }
 0x2ad   :  { %871 = sbr.rel (%p2104_p7) target bundleno = 979 (0x3d3), region = 69  ;;  %2843 = vmatpush1.bf16.msra.mxu0 (!%p2104_p7), %v3674_v23  ;;  %2872 = vmatprep.subr.bf16.mxu1 (!%p2104_p7), %v3510_v19  ;;  %v1038_v38 = vsel (!%p2104_p7), %vm2091_vm2, 1, %v3511_v14  ;;  %v874_v63 = vld [vmem:[#allocation2 + $0x40] sm:$0xff] (!%p2104_p7) }
 0x2ae   :  { %2845 = vmatprep.subr.bf16.mxu0 (!%p2104_p7), %v3677_v27  ;;  %2874 = vmatpush3.bf16.msra.mxu1 (!%p2104_p7), %v3709_v47 }
 0x2af   :  { %940 = vmatprep.mubr.f32.mxu0 (!%p2104_p7), %v3512_v16  ;;  %2875 = vmatprep.subr.bf16.mxu1 (!%p2104_p7), %v3510_v19 }
 0x2b0   :  { %2451 = vmatprep.mubr.msk.f32.mxu1 (!%p2104_p7), %vm3513_vm12, %v3512_v16  ;;  %3282 = vset.pattern.permute.xlu0 (!%p2104_p7), %v3511_v14 }
 0x2b1   :  { %2847 = vmatpush1.bf16.msra.mxu0 (!%p2104_p7), %v3680_v29  ;;  %1040 = vperm.xlu0 (!%p2104_p7), %3282, %v1038_v38   ;;  %v875_v17 = vld [vmem:[#allocation3] sm:$0xff] (!%p2104_p7) }
 0x2b2   :  { %2849 = vmatprep.subr.bf16.mxu0 (!%p2104_p7), %v3682_v30  ;;  %2877 = vmatpush3.bf16.msra.mxu1 (!%p2104_p7), %v3719_v57 }
 0x2b3   :  { %2878 = vmatprep.subr.bf16.mxu1 (!%p2104_p7), %v3510_v19 }
 0x2b5   :  { %2851 = vmatpush1.bf16.msra.mxu0 %v3703_v41 }
 0x2b6   :  { %2853 = vmatprep.subr.bf16.mxu0 %v3706_v42  ;;  %2880 = vmatpush3.bf16.msra.mxu1 %v3730_v4 }
 0x2b7   :  { %2881 = vmatprep.subr.bf16.mxu1 %v3510_v19 }
 0x2b9   :  { %2855 = vmatpush1.bf16.msra.mxu0 %v3713_v51 }
 0x2ba   :  { %2857 = vmatprep.subr.bf16.mxu0 %v3716_v52  ;;  %2883 = vmatpush3.bf16.msra.mxu1 %v3741_v18 }
 0x2bb   :  { %2884 = vmatprep.subr.bf16.mxu1 %v3510_v19 }
 0x2bd   :  { %2859 = vmatpush1.bf16.msra.mxu0 %v3724_v61 }
 0x2be   :  { %2861 = vmatprep.subr.bf16.mxu0 %v3727_v62  ;;  %2886 = vmatpush3.bf16.msra.mxu1 %v3752_v28 }
 0x2bf   :  { %2887 = vmatprep.subr.bf16.mxu1 %v3510_v19 }
 0x2c1   :  { %2863 = vmatpush1.bf16.msra.mxu0 %v3735_v8 }
 0x2c2   :  { %2865 = vmatprep.subr.bf16.mxu0 %v3738_v11  ;;  %2889 = vmatpush3.bf16.msra.mxu1 %v3762_v35 }
 0x2c3   :  { %2890 = vmatprep.subr.bf16.mxu1 %v3510_v19 }
 0x2c5   :  { %2867 = vmatpush1.bf16.msra.mxu0 %v3746_v21 }
 0x2c6   :  { %2869 = vmatprep.subr.bf16.mxu0 %v3749_v24  ;;  %2892 = vmatpush3.bf16.msra.mxu1 %v3770_v39 }
 0x2c7   :  { %2893 = vmatprep.subr.bf16.mxu1 %v3510_v19 }
 0x2c9   :  { %2871 = vmatpush1.bf16.msra.mxu0 %v3758_v34 }
 0x2ca   :  { %2895 = vmatpush3.bf16.msra.mxu1 %v3775_v44 }
 0x2cc   :  { %941 = vmatmul.mubr.f32.vlgmr.msra.gmra.mrb[0].mxu0 %v875_v17 }
 0x2cd   :  { %2452 = vmatmul.mubr.f32.vlgmr.msra.gmra.mrb[0].mxu1 %v875_v17 }
 0x330   :  { %v1041_v50 = vpop.permute.xlu0 %1040 }
 0x331   :  { %vm1042_vm13 = vcmp.eq.s32.totalorder %v1041_v50, 1 }
 0x39f   :  { %v942_v22 = vpop.f32.mrb[0].mxu0 }
 0x3a0   :  { %v943_v25 = vadd.f32 %v942_v22, %v3795_v53  ;;  %v944_v26 = vpop.f32.mrb[1].mxu0  ;;  %v1013_v32 = vpop.f32.mrb[0].mxu1 }
 0x3a1   :  { %v945_v33 = vadd.f32 %v944_v26, %v3800_v55  ;;  %v2453_v3 = vpop.f32.mrb[1].mxu1  ;;  %v1014_v56 = vadd.f32 %v1013_v32, %v3834_v43 }
 0x3a2   :  { %v1017_v36 = vadd.f32 %v943_v25, %v872_v20 }
 0x3a3   :  { %v1018_v9 = vadd.f32 %v945_v33, %v873_v37 }
 0x3a4   :  { %v2105_v40 = vmul.f32 -1.442695, %v1017_v36 }
 0x3a5   :  { %v2106_v46 = vmul.f32 -1.442695, %v1018_v9 }
 0x3a6   :  { %3283 = vpow2.f32 %v2105_v40 }
 0x3a7   :  { %3285 = vpow2.f32 %v2106_v46 }
 0x3b0   :  { %v3284_v15 = vpop.eup %3283 }
 0x3b1   :  { %v1025_v54 = vadd.f32 1.0, %v3284_v15  ;;  %v3286_v48 = vpop.eup %3285 }
 0x3b2   :  { %v1026_v49 = vadd.f32 1.0, %v3286_v48 }
 0x3b3   :  { %3287 = vrcp.f32 %v1025_v54 }
 0x3b4   :  { %3289 = vrcp.f32 %v1026_v49 }
 0x3bd   :  { %v3288_v60 = vpop.eup %3287 }
 0x3be   :  { %v1031_v58 = vmul.f32 %v3288_v60, %v1014_v56  ;;  %v3290_v45 = vpop.eup %3289 }
 0x3bf   :  { %v1034_v59 = vsub.f32 1.0, %v3290_v45  ;;  %v1036_v6 = vmul.f32 %v3290_v45, %v875_v17 }
 0x3c0   :  { %v1032_v1 = vadd.f32 %v1031_v58, %v874_v63 }
 0x3c2   :  { %3291 = vtanh.f32 %v1032_v1 }
 0x3cc   :  { %v3292_v2 = vpop.eup %3291 }
 0x3cd   :  { %v1035_v5 = vmul.f32 %v3292_v2, %v1034_v59 }
 0x3cf   :  { %v1037_v7 = vadd.f32 %v1036_v6, %v1035_v5 }
 0x3d1   :  { %v1043_v10 = vsel %vm1042_vm13, %v1037_v7, %v875_v17  ;;  %v1045_v12 = vsel %vm1042_vm13, %v1037_v7, 0.0 }
 0x3d2   :  { %1044 = vst [vmem:[#allocation3] sm:$0xff] %v1043_v10  ;;  %1047 = vst [vmem:[#allocation14 + $0x10] sm:$0xff] %v1045_v12 }
 0x3d3 PF:  { %p2108_p8 = scmp.le.s32.totalorder %s4095_s0, 3 }
 0x3d4   :  { %2897 = vmatprep.subr.bf16.mxu0 (!%p2108_p8), %v3672_v13  ;;  %v3514_v19 = vmov (!%p2108_p8), 0.0|0.0   ;;  %v3515_v14 = vmov (!%p2108_p8), 0   ;;  %v3516_v16 = vmov (!%p2108_p8), 0.0   ;;  %vm3517_vm14 = vmmov (!%p2108_p8), 0   ;;  %v1053_v20 = vld [vmem:[#allocation2 + $0x48] sm:$0xff] (!%p2108_p8)  ;;  %v1054_v37 = vld [vmem:[#allocation2 + $0x50] sm:$0xff] (!%p2108_p8) }
 0x3d5   :  { %1052 = sbr.rel (%p2108_p8) target bundleno = 1275 (0x4fb), region = 73  ;;  %2899 = vmatpush1.bf16.msra.mxu0 (!%p2108_p8), %v3674_v23  ;;  %2928 = vmatprep.subr.bf16.mxu1 (!%p2108_p8), %v3514_v19  ;;  %v1219_v38 = vsel (!%p2108_p8), %vm2092_vm3, 1, %v3515_v14  ;;  %v1055_v63 = vld [vmem:[#allocation2 + $0x58] sm:$0xff] (!%p2108_p8) }
 0x3d6   :  { %2901 = vmatprep.subr.bf16.mxu0 (!%p2108_p8), %v3677_v27  ;;  %2930 = vmatpush3.bf16.msra.mxu1 (!%p2108_p8), %v3709_v47 }
 0x3d7   :  { %1121 = vmatprep.mubr.f32.mxu0 (!%p2108_p8), %v3516_v16  ;;  %2931 = vmatprep.subr.bf16.mxu1 (!%p2108_p8), %v3514_v19 }
 0x3d8   :  { %2486 = vmatprep.mubr.msk.f32.mxu1 (!%p2108_p8), %vm3517_vm14, %v3516_v16  ;;  %3293 = vset.pattern.permute.xlu0 (!%p2108_p8), %v3515_v14 }
 0x3d9   :  { %2903 = vmatpush1.bf16.msra.mxu0 (!%p2108_p8), %v3680_v29  ;;  %1221 = vperm.xlu0 (!%p2108_p8), %3293, %v1219_v38   ;;  %v1056_v17 = vld [vmem:[#allocation3] sm:$0xff] (!%p2108_p8) }
 0x3da   :  { %2905 = vmatprep.subr.bf16.mxu0 (!%p2108_p8), %v3682_v30  ;;  %2933 = vmatpush3.bf16.msra.mxu1 (!%p2108_p8), %v3719_v57 }
 0x3db   :  { %2934 = vmatprep.subr.bf16.mxu1 (!%p2108_p8), %v3514_v19 }
 0x3dd   :  { %2907 = vmatpush1.bf16.msra.mxu0 %v3703_v41 }
 0x3de   :  { %2909 = vmatprep.subr.bf16.mxu0 %v3706_v42  ;;  %2936 = vmatpush3.bf16.msra.mxu1 %v3730_v4 }
 0x3df   :  { %2937 = vmatprep.subr.bf16.mxu1 %v3514_v19 }
 0x3e1   :  { %2911 = vmatpush1.bf16.msra.mxu0 %v3713_v51 }
 0x3e2   :  { %2913 = vmatprep.subr.bf16.mxu0 %v3716_v52  ;;  %2939 = vmatpush3.bf16.msra.mxu1 %v3741_v18 }
 0x3e3   :  { %2940 = vmatprep.subr.bf16.mxu1 %v3514_v19 }
 0x3e5   :  { %2915 = vmatpush1.bf16.msra.mxu0 %v3724_v61 }
 0x3e6   :  { %2917 = vmatprep.subr.bf16.mxu0 %v3727_v62  ;;  %2942 = vmatpush3.bf16.msra.mxu1 %v3752_v28 }
 0x3e7   :  { %2943 = vmatprep.subr.bf16.mxu1 %v3514_v19 }
 0x3e9   :  { %2919 = vmatpush1.bf16.msra.mxu0 %v3735_v8 }
 0x3ea   :  { %2921 = vmatprep.subr.bf16.mxu0 %v3738_v11  ;;  %2945 = vmatpush3.bf16.msra.mxu1 %v3762_v35 }
 0x3eb   :  { %2946 = vmatprep.subr.bf16.mxu1 %v3514_v19 }
 0x3ed   :  { %2923 = vmatpush1.bf16.msra.mxu0 %v3746_v21 }
 0x3ee   :  { %2925 = vmatprep.subr.bf16.mxu0 %v3749_v24  ;;  %2948 = vmatpush3.bf16.msra.mxu1 %v3770_v39 }
 0x3ef   :  { %2949 = vmatprep.subr.bf16.mxu1 %v3514_v19 }
 0x3f1   :  { %2927 = vmatpush1.bf16.msra.mxu0 %v3758_v34 }
 0x3f2   :  { %2951 = vmatpush3.bf16.msra.mxu1 %v3775_v44 }
 0x3f4   :  { %1122 = vmatmul.mubr.f32.vlgmr.msra.gmra.mrb[0].mxu0 %v1056_v17 }
 0x3f5   :  { %2487 = vmatmul.mubr.f32.vlgmr.msra.gmra.mrb[0].mxu1 %v1056_v17 }
 0x458   :  { %v1222_v50 = vpop.permute.xlu0 %1221 }
 0x459   :  { %vm1223_vm15 = vcmp.eq.s32.totalorder %v1222_v50, 1 }
 0x4c7   :  { %v1123_v22 = vpop.f32.mrb[0].mxu0 }
 0x4c8   :  { %v1124_v25 = vadd.f32 %v1123_v22, %v3795_v53  ;;  %v1125_v26 = vpop.f32.mrb[1].mxu0  ;;  %v1194_v32 = vpop.f32.mrb[0].mxu1 }
 0x4c9   :  { %v1126_v33 = vadd.f32 %v1125_v26, %v3800_v55  ;;  %v2488_v3 = vpop.f32.mrb[1].mxu1  ;;  %v1195_v56 = vadd.f32 %v1194_v32, %v3834_v43 }
 0x4ca   :  { %v1198_v36 = vadd.f32 %v1124_v25, %v1053_v20 }
 0x4cb   :  { %v1199_v9 = vadd.f32 %v1126_v33, %v1054_v37 }
 0x4cc   :  { %v2109_v40 = vmul.f32 -1.442695, %v1198_v36 }
 0x4cd   :  { %v2110_v46 = vmul.f32 -1.442695, %v1199_v9 }
 0x4ce   :  { %3294 = vpow2.f32 %v2109_v40 }
 0x4cf   :  { %3296 = vpow2.f32 %v2110_v46 }
 0x4d8   :  { %v3295_v15 = vpop.eup %3294 }
 0x4d9   :  { %v1206_v54 = vadd.f32 1.0, %v3295_v15  ;;  %v3297_v48 = vpop.eup %3296 }
 0x4da   :  { %v1207_v49 = vadd.f32 1.0, %v3297_v48 }
 0x4db   :  { %3298 = vrcp.f32 %v1206_v54 }
 0x4dc   :  { %3300 = vrcp.f32 %v1207_v49 }
 0x4e5   :  { %v3299_v60 = vpop.eup %3298 }
 0x4e6   :  { %v1212_v58 = vmul.f32 %v3299_v60, %v1195_v56  ;;  %v3301_v45 = vpop.eup %3300 }
 0x4e7   :  { %v1215_v59 = vsub.f32 1.0, %v3301_v45  ;;  %v1217_v6 = vmul.f32 %v3301_v45, %v1056_v17 }
 0x4e8   :  { %v1213_v1 = vadd.f32 %v1212_v58, %v1055_v63 }
 0x4ea   :  { %3302 = vtanh.f32 %v1213_v1 }
 0x4f4   :  { %v3303_v2 = vpop.eup %3302 }
 0x4f5   :  { %v1216_v5 = vmul.f32 %v3303_v2, %v1215_v59 }
 0x4f7   :  { %v1218_v7 = vadd.f32 %v1217_v6, %v1216_v5 }
 0x4f9   :  { %v1224_v10 = vsel %vm1223_vm15, %v1218_v7, %v1056_v17  ;;  %v1226_v12 = vsel %vm1223_vm15, %v1218_v7, 0.0 }
 0x4fa   :  { %1225 = vst [vmem:[#allocation3] sm:$0xff] %v1224_v10  ;;  %1228 = vst [vmem:[#allocation14 + $0x18] sm:$0xff] %v1226_v12 }
 0x4fb PF:  { %p2112_p9 = scmp.le.s32.totalorder %s4095_s0, 4 }
 0x4fc   :  { %2953 = vmatprep.subr.bf16.mxu0 (!%p2112_p9), %v3672_v13  ;;  %v3518_v19 = vmov (!%p2112_p9), 0.0|0.0   ;;  %v3519_v14 = vmov (!%p2112_p9), 0   ;;  %v3520_v16 = vmov (!%p2112_p9), 0.0   ;;  %vm3521_vm0 = vmmov (!%p2112_p9), 0   ;;  %v1234_v20 = vld [vmem:[#allocation2 + $0x60] sm:$0xff] (!%p2112_p9)  ;;  %v1235_v37 = vld [vmem:[#allocation2 + $0x68] sm:$0xff] (!%p2112_p9) }
 0x4fd   :  { %1233 = sbr.rel (%p2112_p9) target bundleno = 1571 (0x623), region = 77  ;;  %2955 = vmatpush1.bf16.msra.mxu0 (!%p2112_p9), %v3674_v23  ;;  %2984 = vmatprep.subr.bf16.mxu1 (!%p2112_p9), %v3518_v19  ;;  %v1400_v38 = vsel (!%p2112_p9), %vm2093_vm4, 1, %v3519_v14  ;;  %v1236_v63 = vld [vmem:[#allocation2 + $0x70] sm:$0xff] (!%p2112_p9) }
 0x4fe   :  { %2957 = vmatprep.subr.bf16.mxu0 (!%p2112_p9), %v3677_v27  ;;  %2986 = vmatpush3.bf16.msra.mxu1 (!%p2112_p9), %v3709_v47 }
 0x4ff   :  { %1302 = vmatprep.mubr.f32.mxu0 (!%p2112_p9), %v3520_v16  ;;  %2987 = vmatprep.subr.bf16.mxu1 (!%p2112_p9), %v3518_v19 }
 0x500   :  { %2521 = vmatprep.mubr.msk.f32.mxu1 (!%p2112_p9), %vm3521_vm0, %v3520_v16  ;;  %3304 = vset.pattern.permute.xlu0 (!%p2112_p9), %v3519_v14 }
 0x501   :  { %2959 = vmatpush1.bf16.msra.mxu0 (!%p2112_p9), %v3680_v29  ;;  %1402 = vperm.xlu0 (!%p2112_p9), %3304, %v1400_v38   ;;  %v1237_v17 = vld [vmem:[#allocation3] sm:$0xff] (!%p2112_p9) }
 0x502   :  { %2961 = vmatprep.subr.bf16.mxu0 (!%p2112_p9), %v3682_v30  ;;  %2989 = vmatpush3.bf16.msra.mxu1 (!%p2112_p9), %v3719_v57 }
 0x503   :  { %2990 = vmatprep.subr.bf16.mxu1 (!%p2112_p9), %v3518_v19 }
 0x505   :  { %2963 = vmatpush1.bf16.msra.mxu0 %v3703_v41 }
 0x506   :  { %2965 = vmatprep.subr.bf16.mxu0 %v3706_v42  ;;  %2992 = vmatpush3.bf16.msra.mxu1 %v3730_v4 }
 0x507   :  { %2993 = vmatprep.subr.bf16.mxu1 %v3518_v19 }
 0x509   :  { %2967 = vmatpush1.bf16.msra.mxu0 %v3713_v51 }
 0x50a   :  { %2969 = vmatprep.subr.bf16.mxu0 %v3716_v52  ;;  %2995 = vmatpush3.bf16.msra.mxu1 %v3741_v18 }
 0x50b   :  { %2996 = vmatprep.subr.bf16.mxu1 %v3518_v19 }
 0x50d   :  { %2971 = vmatpush1.bf16.msra.mxu0 %v3724_v61 }
 0x50e   :  { %2973 = vmatprep.subr.bf16.mxu0 %v3727_v62  ;;  %2998 = vmatpush3.bf16.msra.mxu1 %v3752_v28 }
 0x50f   :  { %2999 = vmatprep.subr.bf16.mxu1 %v3518_v19 }
 0x511   :  { %2975 = vmatpush1.bf16.msra.mxu0 %v3735_v8 }
 0x512   :  { %2977 = vmatprep.subr.bf16.mxu0 %v3738_v11  ;;  %3001 = vmatpush3.bf16.msra.mxu1 %v3762_v35 }
 0x513   :  { %3002 = vmatprep.subr.bf16.mxu1 %v3518_v19 }
 0x515   :  { %2979 = vmatpush1.bf16.msra.mxu0 %v3746_v21 }
 0x516   :  { %2981 = vmatprep.subr.bf16.mxu0 %v3749_v24  ;;  %3004 = vmatpush3.bf16.msra.mxu1 %v3770_v39 }
 0x517   :  { %3005 = vmatprep.subr.bf16.mxu1 %v3518_v19 }
 0x519   :  { %2983 = vmatpush1.bf16.msra.mxu0 %v3758_v34 }
 0x51a   :  { %3007 = vmatpush3.bf16.msra.mxu1 %v3775_v44 }
 0x51c   :  { %1303 = vmatmul.mubr.f32.vlgmr.msra.gmra.mrb[0].mxu0 %v1237_v17 }
 0x51d   :  { %2522 = vmatmul.mubr.f32.vlgmr.msra.gmra.mrb[0].mxu1 %v1237_v17 }
 0x580   :  { %v1403_v50 = vpop.permute.xlu0 %1402 }
 0x581   :  { %vm1404_vm1 = vcmp.eq.s32.totalorder %v1403_v50, 1 }
 0x5ef   :  { %v1304_v22 = vpop.f32.mrb[0].mxu0 }
 0x5f0   :  { %v1305_v25 = vadd.f32 %v1304_v22, %v3795_v53  ;;  %v1306_v26 = vpop.f32.mrb[1].mxu0  ;;  %v1375_v32 = vpop.f32.mrb[0].mxu1 }
 0x5f1   :  { %v1307_v33 = vadd.f32 %v1306_v26, %v3800_v55  ;;  %v2523_v3 = vpop.f32.mrb[1].mxu1  ;;  %v1376_v56 = vadd.f32 %v1375_v32, %v3834_v43 }
 0x5f2   :  { %v1379_v36 = vadd.f32 %v1305_v25, %v1234_v20 }
 0x5f3   :  { %v1380_v9 = vadd.f32 %v1307_v33, %v1235_v37 }
 0x5f4   :  { %v2113_v40 = vmul.f32 -1.442695, %v1379_v36 }
 0x5f5   :  { %v2114_v46 = vmul.f32 -1.442695, %v1380_v9 }
 0x5f6   :  { %3305 = vpow2.f32 %v2113_v40 }
 0x5f7   :  { %3307 = vpow2.f32 %v2114_v46 }
 0x600   :  { %v3306_v15 = vpop.eup %3305 }
 0x601   :  { %v1387_v54 = vadd.f32 1.0, %v3306_v15  ;;  %v3308_v48 = vpop.eup %3307 }
 0x602   :  { %v1388_v49 = vadd.f32 1.0, %v3308_v48 }
 0x603   :  { %3309 = vrcp.f32 %v1387_v54 }
 0x604   :  { %3311 = vrcp.f32 %v1388_v49 }
 0x60d   :  { %v3310_v60 = vpop.eup %3309 }
 0x60e   :  { %v1393_v58 = vmul.f32 %v3310_v60, %v1376_v56  ;;  %v3312_v45 = vpop.eup %3311 }
 0x60f   :  { %v1396_v59 = vsub.f32 1.0, %v3312_v45  ;;  %v1398_v6 = vmul.f32 %v3312_v45, %v1237_v17 }
 0x610   :  { %v1394_v1 = vadd.f32 %v1393_v58, %v1236_v63 }
 0x612   :  { %3313 = vtanh.f32 %v1394_v1 }
 0x61c   :  { %v3314_v2 = vpop.eup %3313 }
 0x61d   :  { %v1397_v5 = vmul.f32 %v3314_v2, %v1396_v59 }
 0x61f   :  { %v1399_v7 = vadd.f32 %v1398_v6, %v1397_v5 }
 0x621   :  { %v1405_v10 = vsel %vm1404_vm1, %v1399_v7, %v1237_v17  ;;  %v1407_v12 = vsel %vm1404_vm1, %v1399_v7, 0.0 }
 0x622   :  { %1406 = vst [vmem:[#allocation3] sm:$0xff] %v1405_v10  ;;  %1409 = vst [vmem:[#allocation14 + $0x20] sm:$0xff] %v1407_v12 }
 0x623 PF:  { %p2116_p10 = scmp.le.s32.totalorder %s4095_s0, 5 }
 0x624   :  { %3009 = vmatprep.subr.bf16.mxu0 (!%p2116_p10), %v3672_v13  ;;  %v3522_v19 = vmov (!%p2116_p10), 0.0|0.0   ;;  %v3523_v14 = vmov (!%p2116_p10), 0   ;;  %v3524_v16 = vmov (!%p2116_p10), 0.0   ;;  %vm3525_vm2 = vmmov (!%p2116_p10), 0   ;;  %v1415_v20 = vld [vmem:[#allocation2 + $0x78] sm:$0xff] (!%p2116_p10)  ;;  %v1416_v37 = vld [vmem:[#allocation2 + $0x80] sm:$0xff] (!%p2116_p10) }
 0x625   :  { %1414 = sbr.rel (%p2116_p10) target bundleno = 1867 (0x74b), region = 81  ;;  %3011 = vmatpush1.bf16.msra.mxu0 (!%p2116_p10), %v3674_v23  ;;  %3040 = vmatprep.subr.bf16.mxu1 (!%p2116_p10), %v3522_v19  ;;  %v1581_v38 = vsel (!%p2116_p10), %vm2094_vm5, 1, %v3523_v14  ;;  %v1417_v63 = vld [vmem:[#allocation2 + $0x88] sm:$0xff] (!%p2116_p10) }
 0x626   :  { %3013 = vmatprep.subr.bf16.mxu0 (!%p2116_p10), %v3677_v27  ;;  %3042 = vmatpush3.bf16.msra.mxu1 (!%p2116_p10), %v3709_v47 }
 0x627   :  { %1483 = vmatprep.mubr.f32.mxu0 (!%p2116_p10), %v3524_v16  ;;  %3043 = vmatprep.subr.bf16.mxu1 (!%p2116_p10), %v3522_v19 }
 0x628   :  { %2556 = vmatprep.mubr.msk.f32.mxu1 (!%p2116_p10), %vm3525_vm2, %v3524_v16  ;;  %3315 = vset.pattern.permute.xlu0 (!%p2116_p10), %v3523_v14 }
 0x629   :  { %3015 = vmatpush1.bf16.msra.mxu0 (!%p2116_p10), %v3680_v29  ;;  %1583 = vperm.xlu0 (!%p2116_p10), %3315, %v1581_v38   ;;  %v1418_v17 = vld [vmem:[#allocation3] sm:$0xff] (!%p2116_p10) }
 0x62a   :  { %3017 = vmatprep.subr.bf16.mxu0 (!%p2116_p10), %v3682_v30  ;;  %3045 = vmatpush3.bf16.msra.mxu1 (!%p2116_p10), %v3719_v57 }
 0x62b   :  { %3046 = vmatprep.subr.bf16.mxu1 (!%p2116_p10), %v3522_v19 }
 0x62d   :  { %3019 = vmatpush1.bf16.msra.mxu0 %v3703_v41 }
 0x62e   :  { %3021 = vmatprep.subr.bf16.mxu0 %v3706_v42  ;;  %3048 = vmatpush3.bf16.msra.mxu1 %v3730_v4 }
 0x62f   :  { %3049 = vmatprep.subr.bf16.mxu1 %v3522_v19 }
 0x631   :  { %3023 = vmatpush1.bf16.msra.mxu0 %v3713_v51 }
 0x632   :  { %3025 = vmatprep.subr.bf16.mxu0 %v3716_v52  ;;  %3051 = vmatpush3.bf16.msra.mxu1 %v3741_v18 }
 0x633   :  { %3052 = vmatprep.subr.bf16.mxu1 %v3522_v19 }
 0x635   :  { %3027 = vmatpush1.bf16.msra.mxu0 %v3724_v61 }
 0x636   :  { %3029 = vmatprep.subr.bf16.mxu0 %v3727_v62  ;;  %3054 = vmatpush3.bf16.msra.mxu1 %v3752_v28 }
 0x637   :  { %3055 = vmatprep.subr.bf16.mxu1 %v3522_v19 }
 0x639   :  { %3031 = vmatpush1.bf16.msra.mxu0 %v3735_v8 }
 0x63a   :  { %3033 = vmatprep.subr.bf16.mxu0 %v3738_v11  ;;  %3057 = vmatpush3.bf16.msra.mxu1 %v3762_v35 }
 0x63b   :  { %3058 = vmatprep.subr.bf16.mxu1 %v3522_v19 }
 0x63d   :  { %3035 = vmatpush1.bf16.msra.mxu0 %v3746_v21 }
 0x63e   :  { %3037 = vmatprep.subr.bf16.mxu0 %v3749_v24  ;;  %3060 = vmatpush3.bf16.msra.mxu1 %v3770_v39 }
 0x63f   :  { %3061 = vmatprep.subr.bf16.mxu1 %v3522_v19 }
 0x641   :  { %3039 = vmatpush1.bf16.msra.mxu0 %v3758_v34 }
 0x642   :  { %3063 = vmatpush3.bf16.msra.mxu1 %v3775_v44 }
 0x644   :  { %1484 = vmatmul.mubr.f32.vlgmr.msra.gmra.mrb[0].mxu0 %v1418_v17 }
 0x645   :  { %2557 = vmatmul.mubr.f32.vlgmr.msra.gmra.mrb[0].mxu1 %v1418_v17 }
 0x6a8   :  { %v1584_v50 = vpop.permute.xlu0 %1583 }
 0x6a9   :  { %vm1585_vm3 = vcmp.eq.s32.totalorder %v1584_v50, 1 }
 0x717   :  { %v1485_v22 = vpop.f32.mrb[0].mxu0 }
 0x718   :  { %v1486_v25 = vadd.f32 %v1485_v22, %v3795_v53  ;;  %v1487_v26 = vpop.f32.mrb[1].mxu0  ;;  %v1556_v32 = vpop.f32.mrb[0].mxu1 }
 0x719   :  { %v1488_v33 = vadd.f32 %v1487_v26, %v3800_v55  ;;  %v2558_v3 = vpop.f32.mrb[1].mxu1  ;;  %v1557_v56 = vadd.f32 %v1556_v32, %v3834_v43 }
 0x71a   :  { %v1560_v36 = vadd.f32 %v1486_v25, %v1415_v20 }
 0x71b   :  { %v1561_v9 = vadd.f32 %v1488_v33, %v1416_v37 }
 0x71c   :  { %v2117_v40 = vmul.f32 -1.442695, %v1560_v36 }
 0x71d   :  { %v2118_v46 = vmul.f32 -1.442695, %v1561_v9 }
 0x71e   :  { %3316 = vpow2.f32 %v2117_v40 }
 0x71f   :  { %3318 = vpow2.f32 %v2118_v46 }
 0x728   :  { %v3317_v15 = vpop.eup %3316 }
 0x729   :  { %v1568_v54 = vadd.f32 1.0, %v3317_v15  ;;  %v3319_v48 = vpop.eup %3318 }
 0x72a   :  { %v1569_v49 = vadd.f32 1.0, %v3319_v48 }
 0x72b   :  { %3320 = vrcp.f32 %v1568_v54 }
 0x72c   :  { %3322 = vrcp.f32 %v1569_v49 }
 0x735   :  { %v3321_v60 = vpop.eup %3320 }
 0x736   :  { %v1574_v58 = vmul.f32 %v3321_v60, %v1557_v56  ;;  %v3323_v45 = vpop.eup %3322 }
 0x737   :  { %v1577_v59 = vsub.f32 1.0, %v3323_v45  ;;  %v1579_v6 = vmul.f32 %v3323_v45, %v1418_v17 }
 0x738   :  { %v1575_v1 = vadd.f32 %v1574_v58, %v1417_v63 }
 0x73a   :  { %3324 = vtanh.f32 %v1575_v1 }
 0x744   :  { %v3325_v2 = vpop.eup %3324 }
 0x745   :  { %v1578_v5 = vmul.f32 %v3325_v2, %v1577_v59 }
 0x747   :  { %v1580_v7 = vadd.f32 %v1579_v6, %v1578_v5 }
 0x749   :  { %v1586_v10 = vsel %vm1585_vm3, %v1580_v7, %v1418_v17  ;;  %v1588_v12 = vsel %vm1585_vm3, %v1580_v7, 0.0 }
 0x74a   :  { %1587 = vst [vmem:[#allocation3] sm:$0xff] %v1586_v10  ;;  %1590 = vst [vmem:[#allocation14 + $0x28] sm:$0xff] %v1588_v12 }
 0x74b PF:  { %p2120_p11 = scmp.le.s32.totalorder %s4095_s0, 6 }
 0x74c   :  { %3065 = vmatprep.subr.bf16.mxu0 (!%p2120_p11), %v3672_v13  ;;  %v3526_v19 = vmov (!%p2120_p11), 0.0|0.0   ;;  %v3527_v14 = vmov (!%p2120_p11), 0   ;;  %v3528_v16 = vmov (!%p2120_p11), 0.0   ;;  %vm3529_vm4 = vmmov (!%p2120_p11), 0   ;;  %v1596_v20 = vld [vmem:[#allocation2 + $0x90] sm:$0xff] (!%p2120_p11)  ;;  %v1597_v37 = vld [vmem:[#allocation2 + $0x98] sm:$0xff] (!%p2120_p11) }
 0x74d   :  { %1595 = sbr.rel (%p2120_p11) target bundleno = 2163 (0x873), region = 85  ;;  %3067 = vmatpush1.bf16.msra.mxu0 (!%p2120_p11), %v3674_v23  ;;  %3096 = vmatprep.subr.bf16.mxu1 (!%p2120_p11), %v3526_v19  ;;  %v1762_v38 = vsel (!%p2120_p11), %vm2095_vm6, 1, %v3527_v14  ;;  %v1598_v63 = vld [vmem:[#allocation2 + $0xa0] sm:$0xff] (!%p2120_p11) }
 0x74e   :  { %3069 = vmatprep.subr.bf16.mxu0 (!%p2120_p11), %v3677_v27  ;;  %3098 = vmatpush3.bf16.msra.mxu1 (!%p2120_p11), %v3709_v47 }
 0x74f   :  { %1664 = vmatprep.mubr.f32.mxu0 (!%p2120_p11), %v3528_v16  ;;  %3099 = vmatprep.subr.bf16.mxu1 (!%p2120_p11), %v3526_v19 }
 0x750   :  { %2591 = vmatprep.mubr.msk.f32.mxu1 (!%p2120_p11), %vm3529_vm4, %v3528_v16  ;;  %3326 = vset.pattern.permute.xlu0 (!%p2120_p11), %v3527_v14 }
 0x751   :  { %3071 = vmatpush1.bf16.msra.mxu0 (!%p2120_p11), %v3680_v29  ;;  %1764 = vperm.xlu0 (!%p2120_p11), %3326, %v1762_v38   ;;  %v1599_v17 = vld [vmem:[#allocation3] sm:$0xff] (!%p2120_p11) }
 0x752   :  { %3073 = vmatprep.subr.bf16.mxu0 (!%p2120_p11), %v3682_v30  ;;  %3101 = vmatpush3.bf16.msra.mxu1 (!%p2120_p11), %v3719_v57 }
 0x753   :  { %3102 = vmatprep.subr.bf16.mxu1 (!%p2120_p11), %v3526_v19 }
 0x755   :  { %3075 = vmatpush1.bf16.msra.mxu0 %v3703_v41 }
 0x756   :  { %3077 = vmatprep.subr.bf16.mxu0 %v3706_v42  ;;  %3104 = vmatpush3.bf16.msra.mxu1 %v3730_v4 }
 0x757   :  { %3105 = vmatprep.subr.bf16.mxu1 %v3526_v19 }
 0x759   :  { %3079 = vmatpush1.bf16.msra.mxu0 %v3713_v51 }
 0x75a   :  { %3081 = vmatprep.subr.bf16.mxu0 %v3716_v52  ;;  %3107 = vmatpush3.bf16.msra.mxu1 %v3741_v18 }
 0x75b   :  { %3108 = vmatprep.subr.bf16.mxu1 %v3526_v19 }
 0x75d   :  { %3083 = vmatpush1.bf16.msra.mxu0 %v3724_v61 }
 0x75e   :  { %3085 = vmatprep.subr.bf16.mxu0 %v3727_v62  ;;  %3110 = vmatpush3.bf16.msra.mxu1 %v3752_v28 }
 0x75f   :  { %3111 = vmatprep.subr.bf16.mxu1 %v3526_v19 }
 0x761   :  { %3087 = vmatpush1.bf16.msra.mxu0 %v3735_v8 }
 0x762   :  { %3089 = vmatprep.subr.bf16.mxu0 %v3738_v11  ;;  %3113 = vmatpush3.bf16.msra.mxu1 %v3762_v35 }
 0x763   :  { %3114 = vmatprep.subr.bf16.mxu1 %v3526_v19 }
 0x765   :  { %3091 = vmatpush1.bf16.msra.mxu0 %v3746_v21 }
 0x766   :  { %3093 = vmatprep.subr.bf16.mxu0 %v3749_v24  ;;  %3116 = vmatpush3.bf16.msra.mxu1 %v3770_v39 }
 0x767   :  { %3117 = vmatprep.subr.bf16.mxu1 %v3526_v19 }
 0x769   :  { %3095 = vmatpush1.bf16.msra.mxu0 %v3758_v34 }
 0x76a   :  { %3119 = vmatpush3.bf16.msra.mxu1 %v3775_v44 }
 0x76c   :  { %1665 = vmatmul.mubr.f32.vlgmr.msra.gmra.mrb[0].mxu0 %v1599_v17 }
 0x76d   :  { %2592 = vmatmul.mubr.f32.vlgmr.msra.gmra.mrb[0].mxu1 %v1599_v17 }
 0x7d0   :  { %v1765_v50 = vpop.permute.xlu0 %1764 }
 0x7d1   :  { %vm1766_vm5 = vcmp.eq.s32.totalorder %v1765_v50, 1 }
 0x83f   :  { %v1666_v22 = vpop.f32.mrb[0].mxu0 }
 0x840   :  { %v1667_v25 = vadd.f32 %v1666_v22, %v3795_v53  ;;  %v1668_v26 = vpop.f32.mrb[1].mxu0  ;;  %v1737_v32 = vpop.f32.mrb[0].mxu1 }
 0x841   :  { %v1669_v33 = vadd.f32 %v1668_v26, %v3800_v55  ;;  %v2593_v3 = vpop.f32.mrb[1].mxu1  ;;  %v1738_v56 = vadd.f32 %v1737_v32, %v3834_v43 }
 0x842   :  { %v1741_v36 = vadd.f32 %v1667_v25, %v1596_v20 }
 0x843   :  { %v1742_v9 = vadd.f32 %v1669_v33, %v1597_v37 }
 0x844   :  { %v2121_v40 = vmul.f32 -1.442695, %v1741_v36 }
 0x845   :  { %v2122_v46 = vmul.f32 -1.442695, %v1742_v9 }
 0x846   :  { %3327 = vpow2.f32 %v2121_v40 }
 0x847   :  { %3329 = vpow2.f32 %v2122_v46 }
 0x850   :  { %v3328_v15 = vpop.eup %3327 }
 0x851   :  { %v1749_v54 = vadd.f32 1.0, %v3328_v15  ;;  %v3330_v48 = vpop.eup %3329 }
 0x852   :  { %v1750_v49 = vadd.f32 1.0, %v3330_v48 }
 0x853   :  { %3331 = vrcp.f32 %v1749_v54 }
 0x854   :  { %3333 = vrcp.f32 %v1750_v49 }
 0x85d   :  { %v3332_v60 = vpop.eup %3331 }
 0x85e   :  { %v1755_v58 = vmul.f32 %v3332_v60, %v1738_v56  ;;  %v3334_v45 = vpop.eup %3333 }
 0x85f   :  { %v1758_v59 = vsub.f32 1.0, %v3334_v45  ;;  %v1760_v6 = vmul.f32 %v3334_v45, %v1599_v17 }
 0x860   :  { %v1756_v1 = vadd.f32 %v1755_v58, %v1598_v63 }
 0x862   :  { %3335 = vtanh.f32 %v1756_v1 }
 0x86c   :  { %v3336_v2 = vpop.eup %3335 }
 0x86d   :  { %v1759_v5 = vmul.f32 %v3336_v2, %v1758_v59 }
 0x86f   :  { %v1761_v7 = vadd.f32 %v1760_v6, %v1759_v5 }
 0x871   :  { %v1767_v10 = vsel %vm1766_vm5, %v1761_v7, %v1599_v17  ;;  %v1769_v12 = vsel %vm1766_vm5, %v1761_v7, 0.0 }
 0x872   :  { %1768 = vst [vmem:[#allocation3] sm:$0xff] %v1767_v10  ;;  %1771 = vst [vmem:[#allocation14 + $0x30] sm:$0xff] %v1769_v12 }
 0x873 PF:  { %p2124_p12 = scmp.le.s32.totalorder %s4095_s0, 7 }
 0x874   :  { %3121 = vmatprep.subr.bf16.mxu0 (!%p2124_p12), %v3672_v13  ;;  %v3530_v19 = vmov (!%p2124_p12), 0.0|0.0   ;;  %v3531_v14 = vmov (!%p2124_p12), 0   ;;  %v3532_v16 = vmov (!%p2124_p12), 0.0   ;;  %vm3533_vm6 = vmmov (!%p2124_p12), 0  }
 0x875   :  { %1776 = sbr.rel (%p2124_p12) target bundleno = 2459 (0x99b), region = 89  ;;  %3123 = vmatpush1.bf16.msra.mxu0 (!%p2124_p12), %v3674_v23  ;;  %3152 = vmatprep.subr.bf16.mxu1 (!%p2124_p12), %v3530_v19  ;;  %v1943_v38 = vsel (!%p2124_p12), %vm2096_vm7, 1, %v3531_v14  ;;  %v1777_v23 = vld [vmem:[#allocation2 + $0xa8] sm:$0xff] (!%p2124_p12) }
 0x876   :  { %3125 = vmatprep.subr.bf16.mxu0 (!%p2124_p12), %v3677_v27  ;;  %3154 = vmatpush3.bf16.msra.mxu1 (!%p2124_p12), %v3709_v47 }
 0x877   :  { %1845 = vmatprep.mubr.f32.mxu0 (!%p2124_p12), %v3532_v16  ;;  %3155 = vmatprep.subr.bf16.mxu1 (!%p2124_p12), %v3530_v19 }
 0x878   :  { %2626 = vmatprep.mubr.msk.f32.mxu1 (!%p2124_p12), %vm3533_vm6, %v3532_v16  ;;  %3337 = vset.pattern.permute.xlu0 (!%p2124_p12), %v3531_v14 }
 0x879   :  { %3127 = vmatpush1.bf16.msra.mxu0 (!%p2124_p12), %v3680_v29  ;;  %1945 = vperm.xlu0 (!%p2124_p12), %3337, %v1943_v38   ;;  %v1780_v13 = vld [vmem:[#allocation3] sm:$0xff] (!%p2124_p12) }
 0x87a   :  { %3129 = vmatprep.subr.bf16.mxu0 (!%p2124_p12), %v3682_v30  ;;  %3157 = vmatpush3.bf16.msra.mxu1 (!%p2124_p12), %v3719_v57 }
 0x87b   :  { %3158 = vmatprep.subr.bf16.mxu1 (!%p2124_p12), %v3530_v19 }
 0x87d   :  { %3131 = vmatpush1.bf16.msra.mxu0 %v3703_v41 }
 0x87e   :  { %3133 = vmatprep.subr.bf16.mxu0 %v3706_v42  ;;  %3160 = vmatpush3.bf16.msra.mxu1 %v3730_v4 }
 0x87f   :  { %3161 = vmatprep.subr.bf16.mxu1 %v3530_v19 }
 0x881   :  { %3135 = vmatpush1.bf16.msra.mxu0 %v3713_v51  ;;  %v1778_v51 = vld [vmem:[#allocation2 + $0xb0] sm:$0xff] }
 0x882   :  { %3137 = vmatprep.subr.bf16.mxu0 %v3716_v52  ;;  %3163 = vmatpush3.bf16.msra.mxu1 %v3741_v18 }
 0x883   :  { %3164 = vmatprep.subr.bf16.mxu1 %v3530_v19 }
 0x885   :  { %3139 = vmatpush1.bf16.msra.mxu0 %v3724_v61 }
 0x886   :  { %3141 = vmatprep.subr.bf16.mxu0 %v3727_v62  ;;  %3166 = vmatpush3.bf16.msra.mxu1 %v3752_v28 }
 0x887   :  { %3167 = vmatprep.subr.bf16.mxu1 %v3530_v19 }
 0x889   :  { %3143 = vmatpush1.bf16.msra.mxu0 %v3735_v8 }
 0x88a   :  { %3145 = vmatprep.subr.bf16.mxu0 %v3738_v11  ;;  %3169 = vmatpush3.bf16.msra.mxu1 %v3762_v35 }
 0x88b   :  { %3170 = vmatprep.subr.bf16.mxu1 %v3530_v19 }
 0x88d   :  { %3147 = vmatpush1.bf16.msra.mxu0 %v3746_v21 }
 0x88e   :  { %3149 = vmatprep.subr.bf16.mxu0 %v3749_v24  ;;  %3172 = vmatpush3.bf16.msra.mxu1 %v3770_v39  ;;  %v1779_v24 = vld [vmem:[#allocation2 + $0xb8] sm:$0xff] }
 0x88f   :  { %3173 = vmatprep.subr.bf16.mxu1 %v3530_v19 }
 0x891   :  { %3151 = vmatpush1.bf16.msra.mxu0 %v3758_v34 }
 0x892   :  { %3175 = vmatpush3.bf16.msra.mxu1 %v3775_v44 }
 0x894   :  { %1846 = vmatmul.mubr.f32.vlgmr.msra.gmra.mrb[0].mxu0 %v1780_v13 }
 0x895   :  { %2627 = vmatmul.mubr.f32.vlgmr.msra.gmra.mrb[0].mxu1 %v1780_v13 }
 0x8f8   :  { %v1946_v39 = vpop.permute.xlu0 %1945 }
 0x8f9   :  { %vm1947_vm7 = vcmp.eq.s32.totalorder %v1946_v39, 1 }
 0x967   :  { %v1847_v27 = vpop.f32.mrb[0].mxu0 }
 0x968   :  { %v1848_v29 = vadd.f32 %v1847_v27, %v3795_v53  ;;  %v1849_v30 = vpop.f32.mrb[1].mxu0  ;;  %v1918_v31 = vpop.f32.mrb[0].mxu1 }
 0x969   :  { %v1850_v41 = vadd.f32 %v1849_v30, %v3800_v55  ;;  %v2628_v42 = vpop.f32.mrb[1].mxu1  ;;  %v1919_v18 = vadd.f32 %v1918_v31, %v3834_v43 }
 0x96a   :  { %v1922_v47 = vadd.f32 %v1848_v29, %v1777_v23 }
 0x96b   :  { %v1923_v57 = vadd.f32 %v1850_v41, %v1778_v51 }
 0x96c   :  { %v2125_v52 = vmul.f32 -1.442695, %v1922_v47 }
 0x96d   :  { %v2126_v61 = vmul.f32 -1.442695, %v1923_v57 }
 0x96e   :  { %3338 = vpow2.f32 %v2125_v52 }
 0x96f   :  { %3340 = vpow2.f32 %v2126_v61 }
 0x978   :  { %v3339_v62 = vpop.eup %3338 }
 0x979   :  { %v1930_v4 = vadd.f32 1.0, %v3339_v62  ;;  %v3341_v8 = vpop.eup %3340 }
 0x97a   :  { %v1931_v11 = vadd.f32 1.0, %v3341_v8 }
 0x97b   :  { %3342 = vrcp.f32 %v1930_v4 }
 0x97c   :  { %3344 = vrcp.f32 %v1931_v11 }
 0x985   :  { %v3343_v21 = vpop.eup %3342 }
 0x986   :  { %v1936_v28 = vmul.f32 %v3343_v21, %v1919_v18  ;;  %v3345_v35 = vpop.eup %3344 }
 0x987   :  { %v1939_v44 = vsub.f32 1.0, %v3345_v35  ;;  %v1941_v17 = vmul.f32 %v3345_v35, %v1780_v13 }
 0x988   :  { %v1937_v34 = vadd.f32 %v1936_v28, %v1779_v24 }
 0x98a   :  { %3346 = vtanh.f32 %v1937_v34 }
 0x994   :  { %v3347_v53 = vpop.eup %3346 }
 0x995   :  { %v1940_v55 = vmul.f32 %v3347_v53, %v1939_v44 }
 0x997   :  { %v1942_v20 = vadd.f32 %v1941_v17, %v1940_v55 }
 0x999   :  { %v1948_v22 = vsel %vm1947_vm7, %v1942_v20, %v1780_v13  ;;  %v1950_v25 = vsel %vm1947_vm7, %v1942_v20, 0.0 }
 0x99a   :  { %1949 = vst [vmem:[#allocation3] sm:$0xff] %v1948_v22  ;;  %1952 = vst [vmem:[#allocation14 + $0x38] sm:$0xff] %v1950_v25 }
 0x99b PF:  { %v1957_v43 = vld [vmem:[#allocation12] sm:$0xff]  ;;  %v1958_v26 = vld [vmem:[#allocation12 + $0x8] sm:$0xff]  ;;  %v1959_v32 = vld [vmem:[#allocation12 + $0x10] sm:$0xff]  ;;  %v3534_v33 = vmov 0.0|0.0   ;;  %vm3535_vm8 = vmmov 0   ;;  %s3536_s0 = smov [#allocation14]  }
 0x99c   :  { %3176 = vmatprep.subr.bf16.mxu0 %v3534_v33  ;;  %v3177_v3 = vpack.c.bf16 %v1958_v26, %v1957_v43  ;;  %v1960_v36 = vld [vmem:[#allocation12 + $0x18] sm:$0xff]  ;;  %2661 = vmatprep.mubr.msk.f32.mxu0 %vm3535_vm8, %v3500_v0  ;;  %v1961_v40 = vld [vmem:[#allocation12 + $0x20] sm:$0xff]  ;;  %v1962_v9 = vld [vmem:[#allocation12 + $0x28] sm:$0xff]  ;;  %s2057_s23 = sshll.u32 %s3536_s0, 4  ;;  %s2058_s23 = int_to_ptr.vmem [resolvable:$true] %s2057_s23 }
 0x99d   :  { %v3180_v37 = vpack.c.bf16 %v1960_v36, %v1959_v32  ;;  %v3183_v46 = vpack.c.bf16 %v1962_v9, %v1961_v40  ;;  %v1963_v15 = vld [vmem:[#allocation12 + $0x30] sm:$0xff]  ;;  %v1964_v54 = vld [vmem:[#allocation12 + $0x38] sm:$0xff]  ;;  %v1965_v49 = vld [vmem:[#allocation12 + $0x40] sm:$0xff]  ;;  %s3438_s24 = scalar_lea.vmem %s2058_s23, 1024  ;;  %p3443_p0 = scmp.lt.s32.totalorder %s2058_s23, %s2058_s23 }
 0x99e   :  { %3178 = vmatpush3.bf16.msra.mxu0 %v3177_v3  ;;  %v3186_v48 = vpack.c.bf16 %v1964_v54, %v1963_v15  ;;  %v1966_v56 = vld [vmem:[#allocation12 + $0x48] sm:$0xff]  ;;  %v1967_v63 = vld [vmem:[#allocation12 + $0x50] sm:$0xff]  ;;  %v1968_v0 = vld [vmem:[#allocation12 + $0x58] sm:$0xff]  ;;  %p3439_p13 = scmp.ne.s32.totalorder %s2058_s23, %s3438_s24  ;;  %p3444_p1 = scmp.lt.s32.totalorder %s3438_s24, %s3438_s24 }
 0x99f   :  { %3179 = vmatprep.subr.bf16.mxu0 %v3534_v33  ;;  %v3189_v60 = vpack.c.bf16 %v1966_v56, %v1965_v49  ;;  %v3192_v58 = vpack.c.bf16 %v1968_v0, %v1967_v63  ;;  %v1969_v1 = vld [vmem:[#allocation12 + $0x60] sm:$0xff]  ;;  %v1970_v45 = vld [vmem:[#allocation12 + $0x68] sm:$0xff]  ;;  %v1971_v59 = vld [vmem:[#allocation12 + $0x70] sm:$0xff] }
 0x9a0   :  { %v3195_v50 = vpack.c.bf16 %v1970_v45, %v1969_v1  ;;  %v1972_v2 = vld [vmem:[#allocation12 + $0x78] sm:$0xff]  ;;  %p3445_p2 = por %p3444_p1, %p3443_p0 }
 0x9a1   :  { %v3198_v5 = vpack.c.bf16 %v1972_v2, %v1971_v59  ;;  %v1956_v6 = vld [vmem:[#allocation3] sm:$0xff] }
 0x9a2   :  { %3181 = vmatpush3.bf16.msra.mxu0 %v3180_v37  ;;  %p3446_p3 = pnand %p3445_p2, %p3439_p13 }
 0x9a3   :  { %3182 = vmatprep.subr.bf16.mxu0 %v3534_v33 }
 0x9a6   :  { %3184 = vmatpush3.bf16.msra.mxu0 %v3183_v46 }
 0x9a7   :  { %3185 = vmatprep.subr.bf16.mxu0 %v3534_v33 }
 0x9aa   :  { %3187 = vmatpush3.bf16.msra.mxu0 %v3186_v48 }
 0x9ab   :  { %3188 = vmatprep.subr.bf16.mxu0 %v3534_v33 }
 0x9ae   :  { %3190 = vmatpush3.bf16.msra.mxu0 %v3189_v60 }
 0x9af   :  { %3191 = vmatprep.subr.bf16.mxu0 %v3534_v33 }
 0x9b2   :  { %3193 = vmatpush3.bf16.msra.mxu0 %v3192_v58 }
 0x9b3   :  { %3194 = vmatprep.subr.bf16.mxu0 %v3534_v33 }
 0x9b6   :  { %3196 = vmatpush3.bf16.msra.mxu0 %v3195_v50 }
 0x9b7   :  { %3197 = vmatprep.subr.bf16.mxu0 %v3534_v33 }
 0x9ba   :  { %3199 = vmatpush3.bf16.msra.mxu0 %v3198_v5 }
 0x9bd   :  { %2662 = vmatmul.mubr.f32.vlgmr.msra.gmra.mrb[0].mxu0 %v1956_v6 }
 0x9be   :  { %3449 = shalt.err (!%p3446_p3)
}
 0x9bf   :  { %s3450_s25 = scalar_lea.hbm %s4104_s9, 1024 }
 0x9c0   :  { %p3451_p4 = scmp.ne.s32.totalorder %s4104_s9, %s3450_s25  ;;  %p3454_p5 = scmp.lt.u32.totalorder %s3450_s25, %s4104_s9 }
 0x9c2   :  { %p3456_p6 = pnand %p3454_p5, %p3451_p4 }
 0x9c4   :  { %3459 = shalt.err (!%p3456_p6)
}
 0x9c5   :  { %2063 = dma.vmem_to_hbm [thread:$0]  %s2058_s23, 1024, %s4104_s9, [#allocation8], %s3496_s3, %s3496_s3, %s3497_s14  }
 0x9c6   :  { %v2127_v7 = vld [vmem:[%s4103_s8] ss:$0 sm:$0xff]  ;;  %s3537_s2 = smov [#allocation15]  }
 0x9c7   :  { %s2070_s28 = sshll.u32 %s3537_s2, 4  ;;  %s2071_s28 = int_to_ptr.vmem [resolvable:$true] %s2070_s28 }
 0x9c8   :  { %s3460_s15 = scalar_lea.vmem %s2071_s28, 128  ;;  %p3465_p8 = scmp.lt.s32.totalorder %s2071_s28, %s2071_s28 }
 0x9c9   :  { %p3461_p7 = scmp.ne.s32.totalorder %s2071_s28, %s3460_s15  ;;  %p3466_p9 = scmp.lt.s32.totalorder %s3460_s15, %s3460_s15 }
 0x9cb   :  { %p3467_p10 = por %p3466_p9, %p3465_p8 }
 0x9cd   :  { %p3468_p11 = pnand %p3467_p10, %p3461_p7 }
 0xa90   :  { %v2046_v10 = vpop.f32.mrb[0].mxu0 }
 0xa91   :  { %v2047_v12 = vadd.f32 %v2127_v7, %v2046_v10  ;;  %v2663_v19 = vpop.f32.mrb[1].mxu0 }
 0xa93   :  { %3348 = vtanh.f32 %v2047_v12 }
 0xa9d   :  { %v3349_v14 = vpop.eup %3348 }
 0xa9e   :  { %2051 = vst [vmem:[#allocation15] sm:$0xff] %v3349_v14 }
 0xa9f   :  { %3471 = shalt.err (!%p3468_p11)
}
 0xaa0   :  { %s3472_s8 = scalar_lea.hbm %s4105_s10, 128 }
 0xaa1   :  { %p3473_p12 = scmp.ne.s32.totalorder %s4105_s10, %s3472_s8  ;;  %p3476_p13 = scmp.lt.u32.totalorder %s3472_s8, %s4105_s10 }
 0xaa3   :  { %p3478_p0 = pnand %p3476_p13, %p3473_p12 }
 0xaa5   :  { %3481 = shalt.err (!%p3478_p0)
}
 0xaa6   :  { %2073 = dma.vmem_to_hbm [thread:$0]  %s2071_s28, 128, %s4105_s10, [#allocation16]  }
 0xaa7   :  { %3488 = dma.done.wait [#allocation8], 1024  }
 0xaa8   :  { %3489 = vsyncadd [#allocation8], 4294966272 }
 0xaa9   :  { %3490 = dma.done.wait [#allocation16], 128  }
 0xaaa   :  { %3491 = vsyncadd [#allocation16], 4294967168 }
 0xaab   :  { %2080 = vsyncpa [#allocation7], 1 }
 0xaac   :  { %2081 = vsyncpa [#allocation10], 1 }
 0xaad   :  { %2082 = vsyncpa [#allocation13], 1 }
 0xaae   :  { %2083 = vsyncpa [#allocation8], 1 }
 0xaaf   :  { %2084 = vsyncpa [#allocation16], 1 }

</bundles_post_ra>
